<compile_context>
chip_gen: v5e
topology: v5e:2x2
jax: 0.10.0
libtpu: 0.0.40
codegen_flags: <defaults>
</compile_context>

<pallas_src>
import functools
import math

import jax
import jax.numpy as jnp
import numpy as np
from jax.experimental import pallas as pl
from jax.experimental.pallas import tpu as pltpu


_VMEM = pl.BlockSpec(memory_space=pltpu.MemorySpace.VMEM)
_SQRT1_2 = 1.0 / math.sqrt(2.0)
_NEG_INF = -1e30


# ----------------------------- fused kernel ----------------------------- #

def _layer_norm(x, g, b, eps):
    mu = jnp.mean(x, axis=-1, keepdims=True)
    var = jnp.mean((x - mu) * (x - mu), axis=-1, keepdims=True)
    return (x - mu) * jax.lax.rsqrt(var + eps) * g + b


def _gelu_exact(x):
    # torch.nn.GELU(approximate='none')
    return 0.5 * x * (1.0 + jax.lax.erf(x * _SQRT1_2))


def _vit_fused_kernel(
    patches_ref,        # (BS, CPP+2+BS) bf16: pixels | bias-ind | cls-ind | I_BS (pos select)
    wemb_ref,           # (CPP+2+BS, D)  bf16: [conv_w ; conv_b ; cls_token ; pos tiled over B]
    pvec_ref,           # (L, 6, D)  f32: ln1_g, ln1_b, ln2_g, ln2_b, proj_b, fc2_b
    qkv_w_ref,          # (L, D, 3D) bf16 (1/sqrt(Dh) folded into Q columns)
    qkv_b_ref,          # (L, 1, 3D) f32  (scale folded into Q part)
    proj_w_ref,         # (L, D, D)  bf16
    fc1_w_ref,          # (L, D, MLP) bf16
    fc1_b_ref,          # (L, 1, MLP) f32
    fc2_w_ref,          # (L, MLP, D) bf16
    lnf_ref,            # (2, D) f32  (final LN gamma / beta)
    head_w_ref,         # (D, NC) bf16
    head_b_ref,         # (1, NC) f32
    o_ref,              # (B, NC) f32
    *, seq_len, num_heads, eps):
    f32 = jnp.float32
    bf16 = jnp.bfloat16
    BS = patches_ref.shape[0]
    D = wemb_ref.shape[1]
    S = seq_len
    B = BS // S
    H = num_heads
    Dh = D // H
    L = qkv_w_ref.shape[0]

    # patch embedding: conv bias, cls token and positional embedding are all picked up via
    # the indicator / identity columns, so this one matmul yields the ready token stream.
    x = jnp.dot(patches_ref[...], wemb_ref[...], preferred_element_type=f32)

    # block-diagonal attention bias, built in-registers (tokens attend only within their own
    # batch element).  Compare/select only -> a couple of VPU ops; hoisted for all layers.
    rb = jax.lax.broadcasted_iota(jnp.int32, (BS, BS), 0)
    cb = jax.lax.broadcasted_iota(jnp.int32, (BS, BS), 1)
    same = None
    for b in range(B):                       # static unroll over batch blocks (no int div)
        lo, hi = b * S, (b + 1) * S
        t = (rb >= lo) & (rb < hi) & (cb >= lo) & (cb < hi)
        same = t if same is None else jnp.logical_or(same, t)
    attn_bias = jnp.where(same, 0.0, _NEG_INF)          # f32 (BS, BS)

    for l in range(L):                       # static unroll (L = 2)
        pv = pvec_ref[l]                     # (6, D): ln1_g/b, ln2_g/b, proj_b, fc2_b
        g1, b1 = pv[0:1, :], pv[1:2, :]
        g2, b2 = pv[2:3, :], pv[3:4, :]
        proj_b, fc2_b = pv[4:5, :], pv[5:6, :]

        # ---------------- multi-head self-attention ----------------
        h_in = _layer_norm(x, g1, b1, eps).astype(bf16)
        qkv = jnp.dot(h_in, qkv_w_ref[l], preferred_element_type=f32) + qkv_b_ref[l]
        qkv_bf = qkv.astype(bf16)
        ohs = []
        for h in range(H):                   # static unroll; scale already folded into Q
            qh = qkv_bf[:, h * Dh:(h + 1) * Dh]
            kh = qkv_bf[:, D + h * Dh:D + (h + 1) * Dh]
            vh = qkv_bf[:, 2 * D + h * Dh:2 * D + (h + 1) * Dh]
            # contract last dims directly (no k.T materialization)
            s = jax.lax.dot_general(qh, kh, (((1,), (1,)), ((), ())),
                                    preferred_element_type=f32)
            s = s + attn_bias
            s = s - jnp.max(s, axis=-1, keepdims=True)
            p = jnp.exp(s)
            p = p * pl.reciprocal(jnp.sum(p, axis=-1, keepdims=True), approx=True)
            ohs.append(jnp.dot(p.astype(bf16), vh, preferred_element_type=f32))
        # merged output projection: one (BS,D)x(D,D) matmul instead of H small ones
        ctx = jnp.concatenate(ohs, axis=-1)                      # (BS, D)
        attn = jnp.dot(ctx.astype(bf16), proj_w_ref[l],
                       preferred_element_type=f32) + proj_b
        x = x + attn                                             # residual (f32)

        # ---------------- MLP ----------------
        h2 = _layer_norm(x, g2, b2, eps).astype(bf16)
        m = jnp.dot(h2, fc1_w_ref[l], preferred_element_type=f32) + fc1_b_ref[l]
        m = _gelu_exact(m)
        m = jnp.dot(m.astype(bf16), fc2_w_ref[l], preferred_element_type=f32) + fc2_b
        x = x + m                                                # residual (f32)

    # cls rows (row b*S) extracted BEFORE the final LN (LN is per-row, so it commutes with
    # row selection): LN + head only run on (B, D).
    cls_rows = [x[b * S:b * S + 1, :] for b in range(B)]
    cls_tok = cls_rows[0] if B == 1 else jnp.concatenate(cls_rows, axis=0)   # (B, D)
    cls_n = _layer_norm(cls_tok, lnf_ref[0:1, :], lnf_ref[1:2, :], eps)
    logits = jnp.dot(cls_n.astype(bf16), head_w_ref[...],
                     preferred_element_type=f32) + head_b_ref[...]
    o_ref[...] = logits.astype(o_ref.dtype)


# ----------------------------- wrappers ----------------------------- #

def pack_params(params, *, batch, num_heads, pos_emb_flag=True):
    """One-time parameter packing (outside the forward path):
       - conv bias + cls token + positional embedding folded into one embedding matrix,
       - 1/sqrt(Dh) folded into the Q columns of qkv_w / qkv_b,
       - all per-layer (D,)-sized params packed into a single (L, 6, D) array,
       - matmul weights stored in bf16 (f32 accumulation in-kernel)."""
    f32, bf16 = jnp.float32, jnp.bfloat16
    D = params["conv_w"].shape[1]
    Dh = D // num_heads
    pos = params["pos"].reshape(-1, D)                    # (S, D)
    if not pos_emb_flag:
        pos = jnp.zeros_like(pos)
    layers = params["layers"]
    L = len(layers)
    mlp = layers[0]["fc1_w"].shape[1]
    stk = lambda name: jnp.stack([lyr[name] for lyr in layers], axis=0)

    # fold the attention scale into the Q columns
    scale = 1.0 / math.sqrt(Dh)
    scale_vec = jnp.concatenate([jnp.full((D,), scale, f32), jnp.ones((2 * D,), f32)])
    qkv_w = stk("qkv_w") * scale_vec                      # (L, D, 3D)
    qkv_b = stk("qkv_b") * scale_vec                      # (L, 3D)

    wemb_aug = jnp.concatenate(
        [params["conv_w"], params["conv_b"].reshape(1, D),
         params["cls"].reshape(1, D), jnp.tile(pos, (batch, 1))], axis=0)  # (CPP+2+BS, D)

    pvec = jnp.stack([stk("ln1_g"), stk("ln1_b"), stk("ln2_g"), stk("ln2_b"),
                      stk("proj_b"), stk("fc2_b")], axis=1)                # (L, 6, D)

    return dict(
        wemb=wemb_aug.astype(bf16),
        pvec=pvec.astype(f32),
        qkv_w=qkv_w.astype(bf16),
        qkv_b=qkv_b.reshape(L, 1, 3 * D).astype(f32),
        proj_w=stk("proj_w").astype(bf16),
        fc1_w=stk("fc1_w").astype(bf16),
        fc1_b=stk("fc1_b").reshape(L, 1, mlp).astype(f32),
        fc2_w=stk("fc2_w").astype(bf16),
        lnf=jnp.stack([params["ln_g"], params["ln_b"]], axis=0).astype(f32),   # (2, D)
        head_w=params["head_w"].astype(bf16),
        head_b=params["head_b"].reshape(1, -1).astype(f32),
    )


def vit_forward(x_img, packed, *, patch, num_heads):
    B, C, Himg, Wimg = x_img.shape
    nh, nw = Himg // patch, Wimg // patch
    N = nh * nw
    S = N + 1
    BS = B * S
    CPP = C * patch * patch
    L, D = packed["qkv_w"].shape[0], packed["qkv_w"].shape[1]
    MLP = packed["fc1_w"].shape[2]
    NC = packed["head_w"].shape[1]
    Dh = D // num_heads

    # --- layout glue (plain JAX): (C, ph, pw)-ordered patch flattening, a zero "pixel" row
    #     per batch element for the cls position, indicator columns that select the conv-bias
    #     / cls-token rows, and an identity block that selects the positional-embedding row. ---
    p = x_img.reshape(B, C, nh, patch, nw, patch)
    p = jnp.transpose(p, (0, 2, 4, 1, 3, 5)).reshape(B, N, CPP)
    px = jnp.concatenate([jnp.zeros((B, 1, CPP), p.dtype), p], axis=1).reshape(BS, CPP)
    is_patch = np.concatenate([np.zeros((1, 1)), np.ones((N, 1))], axis=0)       # (S, 1)
    ind = np.tile(np.concatenate([is_patch, 1.0 - is_patch], axis=1), (B, 1))    # (BS, 2)
    aug = np.concatenate([ind, np.eye(BS)], axis=1)                              # (BS, 2+BS)
    patches_aug = jnp.concatenate([px, jnp.asarray(aug, px.dtype)],
                                  axis=-1).astype(jnp.bfloat16)                  # (BS, CPP+2+BS)

    inputs = (patches_aug, packed["wemb"], packed["pvec"], packed["qkv_w"],
              packed["qkv_b"], packed["proj_w"], packed["fc1_w"], packed["fc1_b"],
              packed["fc2_w"], packed["lnf"], packed["head_w"], packed["head_b"])

    # advisory cost estimate for the XLA scheduler
    Kdim = patches_aug.shape[1]
    per_layer_macs = BS * D * 3 * D + 2 * num_heads * BS * BS * Dh + BS * D * D \
        + 2 * BS * D * MLP
    flops = 2 * (BS * Kdim * D + L * per_layer_macs + B * D * NC)
    transcendentals = L * (num_heads * BS * BS + BS * MLP) + (2 * L + 1) * BS
    bytes_accessed = sum(int(np.prod(a.shape)) * a.dtype.itemsize for a in inputs) \
        + B * NC * 4

    kernel = functools.partial(_vit_fused_kernel, seq_len=S, num_heads=num_heads, eps=1e-6)
    return pl.pallas_call(
        kernel,
        out_shape=jax.ShapeDtypeStruct((B, NC), jnp.float32),
        in_specs=[_VMEM] * len(inputs),
        out_specs=_VMEM,
        compiler_params=pltpu.CompilerParams(vmem_limit_bytes=16 * 1024 * 1024),
        cost_estimate=pl.CostEstimate(flops=int(flops),
                                      transcendentals=int(transcendentals),
                                      bytes_accessed=int(bytes_accessed)),
    )(*inputs)


# ----------------------------- deterministic init ----------------------------- #

def init_params(key, *, C, patch, D, num_heads, mlp, layers, seq, num_classes):
    def nrm(k, shape, std=0.02):
        return (std * jax.random.normal(k, shape)).astype(jnp.float32)

    keys = iter(jax.random.split(key, 8 + 10 * layers))
    params = {
        "conv_w": nrm(next(keys), (C * patch * patch, D)),
        "conv_b": jnp.zeros((D,), jnp.float32),
        "cls": jnp.zeros((1, 1, D), jnp.float32),
        "pos": nrm(next(keys), (1, seq, D)),
        "ln_g": jnp.ones((D,), jnp.float32),
        "ln_b": jnp.zeros((D,), jnp.float32),
        "head_w": nrm(next(keys), (D, num_classes)),
        "head_b": jnp.zeros((num_classes,), jnp.float32),
        "layers": [],
    }
    for _ in range(layers):
        params["layers"].append({
            "ln1_g": jnp.ones((D,), jnp.float32),
            "ln1_b": jnp.zeros((D,), jnp.float32),
            "qkv_w": nrm(next(keys), (D, 3 * D)),
            "qkv_b": jnp.zeros((3 * D,), jnp.float32),
            "proj_w": nrm(next(keys), (D, D)),
            "proj_b": jnp.zeros((D,), jnp.float32),
            "ln2_g": jnp.ones((D,), jnp.float32),
            "ln2_b": jnp.zeros((D,), jnp.float32),
            "fc1_w": nrm(next(keys), (D, mlp)),
            "fc1_b": jnp.zeros((mlp,), jnp.float32),
            "fc2_w": nrm(next(keys), (mlp, D)),
            "fc2_b": jnp.zeros((D,), jnp.float32),
        })
    return params


# ----------------------------- main ----------------------------- #

if __name__ == "__main__":
    # scaled-down ViT-L/16 config
    B, C, IMG, PATCH = 2, 3, 32, 16
    D, HEADS, MLP, LAYERS, CLASSES = 32, 4, 64, 2, 10
    SEQ = (IMG // PATCH) * (IMG // PATCH) + 1   # patches + cls token = 5

    key = jax.random.PRNGKey(0)
    k_x, k_p = jax.random.split(key)
    x = jax.random.normal(k_x, (B, C, IMG, IMG), dtype=jnp.float32)
    params = init_params(k_p, C=C, patch=PATCH, D=D, num_heads=HEADS, mlp=MLP,
                         layers=LAYERS, seq=SEQ, num_classes=CLASSES)
    packed = pack_params(params, batch=B, num_heads=HEADS, pos_emb_flag=True)

    # TODO(synk): pretrained-weight loading, torchvision preprocess transforms, and the
    # forward-hook activation capture (forward_features) have no Pallas equivalent; the
    # numerical forward pass itself is fully implemented above.
    fwd = jax.jit(functools.partial(vit_forward, patch=PATCH, num_heads=HEADS))
    logits = fwd(x, packed)
    logits = jax.block_until_ready(logits)

    assert logits.shape == (B, CLASSES), logits.shape
    assert bool(jnp.all(jnp.isfinite(logits))), "non-finite output"
    print("KERNEL_OK")
</pallas_src>

<mosaic_0001>
module attributes {stable_mosaic.version = 11 : i64} {
  func.func @_vit_fused_kernel(%arg0: memref<10x780xbf16, #tpu.memory_space<vmem>>, %arg1: memref<780x32xbf16, #tpu.memory_space<vmem>>, %arg2: memref<2x6x32xf32, #tpu.memory_space<vmem>>, %arg3: memref<2x32x96xbf16, #tpu.memory_space<vmem>>, %arg4: memref<2x1x96xf32, #tpu.memory_space<vmem>>, %arg5: memref<2x32x32xbf16, #tpu.memory_space<vmem>>, %arg6: memref<2x32x64xbf16, #tpu.memory_space<vmem>>, %arg7: memref<2x1x64xf32, #tpu.memory_space<vmem>>, %arg8: memref<2x64x32xbf16, #tpu.memory_space<vmem>>, %arg9: memref<2x32xf32, #tpu.memory_space<vmem>>, %arg10: memref<32x10xbf16, #tpu.memory_space<vmem>>, %arg11: memref<1x10xf32, #tpu.memory_space<vmem>>, %arg12: memref<2x10xf32, #tpu.memory_space<vmem>>) attributes {dimension_semantics = [], scalar_prefetch = 0 : i64, scratch_operands = 0 : i64, tpu.core_type = #tpu.core_type<tc>} {
    %c0 = arith.constant 0 : index
    %c0_0 = arith.constant 0 : index
    %0 = vector.load %arg0[%c0, %c0_0] : memref<10x780xbf16, #tpu.memory_space<vmem>>, vector<10x780xbf16>
    %c0_1 = arith.constant 0 : index
    %c0_2 = arith.constant 0 : index
    %1 = vector.load %arg1[%c0_1, %c0_2] : memref<780x32xbf16, #tpu.memory_space<vmem>>, vector<780x32xbf16>
    %cst = arith.constant dense<0.000000e+00> : vector<10x32xf32>
    %2 = tpu.matmul %0, %1, %cst {dimension_numbers = #tpu.dot_dimension_numbers<[1], [0], [0], [1], [0, 0, 1, 1], [], []>} : vector<10x780xbf16>, vector<780x32xbf16>, vector<10x32xf32> -> vector<10x32xf32>
    %3 = tpu.iota {dimensions = array<i32: 0>} : vector<10x10xi32>
    %4 = tpu.iota {dimensions = array<i32: 1>} : vector<10x10xi32>
    %c0_i32 = arith.constant 0 : i32
    %5 = vector.broadcast %c0_i32 : i32 to vector<10x10xi32>
    %6 = arith.cmpi sge, %3, %5 : vector<10x10xi32>
    %c5_i32 = arith.constant 5 : i32
    %7 = vector.broadcast %c5_i32 : i32 to vector<10x10xi32>
    %8 = arith.cmpi slt, %3, %7 : vector<10x10xi32>
    %9 = arith.andi %6, %8 : vector<10x10xi1>
    %c0_i32_3 = arith.constant 0 : i32
    %10 = vector.broadcast %c0_i32_3 : i32 to vector<10x10xi32>
    %11 = arith.cmpi sge, %4, %10 : vector<10x10xi32>
    %12 = arith.andi %9, %11 : vector<10x10xi1>
    %c5_i32_4 = arith.constant 5 : i32
    %13 = vector.broadcast %c5_i32_4 : i32 to vector<10x10xi32>
    %14 = arith.cmpi slt, %4, %13 : vector<10x10xi32>
    %15 = arith.andi %12, %14 : vector<10x10xi1>
    %c5_i32_5 = arith.constant 5 : i32
    %16 = vector.broadcast %c5_i32_5 : i32 to vector<10x10xi32>
    %17 = arith.cmpi sge, %3, %16 : vector<10x10xi32>
    %c10_i32 = arith.constant 10 : i32
    %18 = vector.broadcast %c10_i32 : i32 to vector<10x10xi32>
    %19 = arith.cmpi slt, %3, %18 : vector<10x10xi32>
    %20 = arith.andi %17, %19 : vector<10x10xi1>
    %c5_i32_6 = arith.constant 5 : i32
    %21 = vector.broadcast %c5_i32_6 : i32 to vector<10x10xi32>
    %22 = arith.cmpi sge, %4, %21 : vector<10x10xi32>
    %23 = arith.andi %20, %22 : vector<10x10xi1>
    %c10_i32_7 = arith.constant 10 : i32
    %24 = vector.broadcast %c10_i32_7 : i32 to vector<10x10xi32>
    %25 = arith.cmpi slt, %4, %24 : vector<10x10xi32>
    %26 = arith.andi %23, %25 : vector<10x10xi1>
    %27 = arith.ori %15, %26 : vector<10x10xi1>
    %cst_8 = arith.constant 0.000000e+00 : f32
    %cst_9 = arith.constant -1.000000e+30 : f32
    %28 = vector.broadcast %cst_8 : f32 to vector<10x10xf32>
    %29 = vector.broadcast %cst_9 : f32 to vector<10x10xf32>
    %30 = arith.select %27, %28, %29 : vector<10x10xi1>, vector<10x10xf32>
    %c0_10 = arith.constant 0 : index
    %c0_11 = arith.constant 0 : index
    %c0_12 = arith.constant 0 : index
    %31 = vector.load %arg2[%c0_10, %c0_11, %c0_12] : memref<2x6x32xf32, #tpu.memory_space<vmem>>, vector<1x6x32xf32>
    %32 = vector.shape_cast %31 : vector<1x6x32xf32> to vector<6x32xf32>
    %33 = vector.extract_strided_slice %32 {offsets = [0, 0], sizes = [1, 32], strides = [1, 1]} : vector<6x32xf32> to vector<1x32xf32>
    %34 = vector.extract_strided_slice %32 {offsets = [1, 0], sizes = [1, 32], strides = [1, 1]} : vector<6x32xf32> to vector<1x32xf32>
    %35 = vector.extract_strided_slice %32 {offsets = [2, 0], sizes = [1, 32], strides = [1, 1]} : vector<6x32xf32> to vector<1x32xf32>
    %36 = vector.extract_strided_slice %32 {offsets = [3, 0], sizes = [1, 32], strides = [1, 1]} : vector<6x32xf32> to vector<1x32xf32>
    %37 = vector.extract_strided_slice %32 {offsets = [4, 0], sizes = [1, 32], strides = [1, 1]} : vector<6x32xf32> to vector<1x32xf32>
    %38 = vector.extract_strided_slice %32 {offsets = [5, 0], sizes = [1, 32], strides = [1, 1]} : vector<6x32xf32> to vector<1x32xf32>
    %cst_13 = arith.constant dense<0.000000e+00> : vector<10xf32>
    %39 = vector.multi_reduction <add>, %2, %cst_13 [1] : vector<10x32xf32> to vector<10xf32>
    %40 = vector.shape_cast %39 : vector<10xf32> to vector<10x1xf32>
    %cst_14 = arith.constant 3.200000e+01 : f32
    %41 = vector.broadcast %cst_14 : f32 to vector<10x1xf32>
    %42 = arith.divf %40, %41 : vector<10x1xf32>
    %43 = vector.broadcast %42 : vector<10x1xf32> to vector<10x32xf32>
    %44 = arith.subf %2, %43 : vector<10x32xf32>
    %45 = vector.broadcast %42 : vector<10x1xf32> to vector<10x32xf32>
    %46 = arith.subf %2, %45 : vector<10x32xf32>
    %47 = arith.mulf %44, %46 : vector<10x32xf32>
    %cst_15 = arith.constant dense<0.000000e+00> : vector<10xf32>
    %48 = vector.multi_reduction <add>, %47, %cst_15 [1] : vector<10x32xf32> to vector<10xf32>
    %49 = vector.shape_cast %48 : vector<10xf32> to vector<10x1xf32>
    %cst_16 = arith.constant 3.200000e+01 : f32
    %50 = vector.broadcast %cst_16 : f32 to vector<10x1xf32>
    %51 = arith.divf %49, %50 : vector<10x1xf32>
    %52 = vector.broadcast %42 : vector<10x1xf32> to vector<10x32xf32>
    %53 = arith.subf %2, %52 : vector<10x32xf32>
    %cst_17 = arith.constant 9.99999997E-7 : f32
    %54 = vector.broadcast %cst_17 : f32 to vector<10x1xf32>
    %55 = arith.addf %51, %54 : vector<10x1xf32>
    %56 = math.rsqrt %55 : vector<10x1xf32>
    %57 = vector.broadcast %56 : vector<10x1xf32> to vector<10x32xf32>
    %58 = arith.mulf %53, %57 : vector<10x32xf32>
    %59 = vector.broadcast %33 : vector<1x32xf32> to vector<10x32xf32>
    %60 = arith.mulf %58, %59 : vector<10x32xf32>
    %61 = vector.broadcast %34 : vector<1x32xf32> to vector<10x32xf32>
    %62 = arith.addf %60, %61 : vector<10x32xf32>
    %63 = arith.truncf %62 : vector<10x32xf32> to vector<10x32xbf16>
    %c0_18 = arith.constant 0 : index
    %c0_19 = arith.constant 0 : index
    %c0_20 = arith.constant 0 : index
    %64 = vector.load %arg3[%c0_18, %c0_19, %c0_20] : memref<2x32x96xbf16, #tpu.memory_space<vmem>>, vector<1x32x96xbf16>
    %65 = vector.shape_cast %64 : vector<1x32x96xbf16> to vector<32x96xbf16>
    %cst_21 = arith.constant dense<0.000000e+00> : vector<10x96xf32>
    %66 = tpu.matmul %63, %65, %cst_21 {dimension_numbers = #tpu.dot_dimension_numbers<[1], [0], [0], [1], [0, 0, 1, 1], [], []>} : vector<10x32xbf16>, vector<32x96xbf16>, vector<10x96xf32> -> vector<10x96xf32>
    %c0_22 = arith.constant 0 : index
    %c0_23 = arith.constant 0 : index
    %c0_24 = arith.constant 0 : index
    %67 = vector.load %arg4[%c0_22, %c0_23, %c0_24] : memref<2x1x96xf32, #tpu.memory_space<vmem>>, vector<1x1x96xf32>
    %68 = vector.shape_cast %67 : vector<1x1x96xf32> to vector<1x96xf32>
    %69 = vector.broadcast %68 : vector<1x96xf32> to vector<10x96xf32>
    %70 = arith.addf %66, %69 : vector<10x96xf32>
    %71 = arith.truncf %70 : vector<10x96xf32> to vector<10x96xbf16>
    %72 = vector.extract_strided_slice %71 {offsets = [0, 0], sizes = [10, 8], strides = [1, 1]} : vector<10x96xbf16> to vector<10x8xbf16>
    %73 = vector.extract_strided_slice %71 {offsets = [0, 32], sizes = [10, 8], strides = [1, 1]} : vector<10x96xbf16> to vector<10x8xbf16>
    %74 = vector.extract_strided_slice %71 {offsets = [0, 64], sizes = [10, 8], strides = [1, 1]} : vector<10x96xbf16> to vector<10x8xbf16>
    %cst_25 = arith.constant dense<0.000000e+00> : vector<10x10xf32>
    %75 = tpu.matmul %72, %73, %cst_25 {dimension_numbers = #tpu.dot_dimension_numbers<[1], [1], [0], [0], [0, 0, 1, 0], [], []>} : vector<10x8xbf16>, vector<10x8xbf16>, vector<10x10xf32> -> vector<10x10xf32>
    %76 = arith.addf %75, %30 : vector<10x10xf32>
    %cst_26 = arith.constant dense<0xFF800000> : vector<10xf32>
    %77 = vector.multi_reduction <maximumf>, %76, %cst_26 [1] : vector<10x10xf32> to vector<10xf32>
    %78 = vector.shape_cast %77 : vector<10xf32> to vector<10x1xf32>
    %79 = vector.broadcast %78 : vector<10x1xf32> to vector<10x10xf32>
    %80 = arith.subf %76, %79 : vector<10x10xf32>
    %81 = math.exp %80 : vector<10x10xf32>
    %cst_27 = arith.constant dense<0.000000e+00> : vector<10xf32>
    %82 = vector.multi_reduction <add>, %81, %cst_27 [1] : vector<10x10xf32> to vector<10xf32>
    %83 = vector.shape_cast %82 : vector<10xf32> to vector<10x1xf32>
    %84 = tpu.reciprocal %83 {approx = true} : vector<10x1xf32> -> vector<10x1xf32>
    %85 = vector.broadcast %84 : vector<10x1xf32> to vector<10x10xf32>
    %86 = arith.mulf %81, %85 : vector<10x10xf32>
    %87 = arith.truncf %86 : vector<10x10xf32> to vector<10x10xbf16>
    %cst_28 = arith.constant dense<0.000000e+00> : vector<10x8xf32>
    %88 = tpu.matmul %87, %74, %cst_28 {dimension_numbers = #tpu.dot_dimension_numbers<[1], [0], [0], [1], [0, 0, 1, 1], [], []>} : vector<10x10xbf16>, vector<10x8xbf16>, vector<10x8xf32> -> vector<10x8xf32>
    %89 = vector.extract_strided_slice %71 {offsets = [0, 8], sizes = [10, 8], strides = [1, 1]} : vector<10x96xbf16> to vector<10x8xbf16>
    %90 = vector.extract_strided_slice %71 {offsets = [0, 40], sizes = [10, 8], strides = [1, 1]} : vector<10x96xbf16> to vector<10x8xbf16>
    %91 = vector.extract_strided_slice %71 {offsets = [0, 72], sizes = [10, 8], strides = [1, 1]} : vector<10x96xbf16> to vector<10x8xbf16>
    %cst_29 = arith.constant dense<0.000000e+00> : vector<10x10xf32>
    %92 = tpu.matmul %89, %90, %cst_29 {dimension_numbers = #tpu.dot_dimension_numbers<[1], [1], [0], [0], [0, 0, 1, 0], [], []>} : vector<10x8xbf16>, vector<10x8xbf16>, vector<10x10xf32> -> vector<10x10xf32>
    %93 = arith.addf %92, %30 : vector<10x10xf32>
    %cst_30 = arith.constant dense<0xFF800000> : vector<10xf32>
    %94 = vector.multi_reduction <maximumf>, %93, %cst_30 [1] : vector<10x10xf32> to vector<10xf32>
    %95 = vector.shape_cast %94 : vector<10xf32> to vector<10x1xf32>
    %96 = vector.broadcast %95 : vector<10x1xf32> to vector<10x10xf32>
    %97 = arith.subf %93, %96 : vector<10x10xf32>
    %98 = math.exp %97 : vector<10x10xf32>
    %cst_31 = arith.constant dense<0.000000e+00> : vector<10xf32>
    %99 = vector.multi_reduction <add>, %98, %cst_31 [1] : vector<10x10xf32> to vector<10xf32>
    %100 = vector.shape_cast %99 : vector<10xf32> to vector<10x1xf32>
    %101 = tpu.reciprocal %100 {approx = true} : vector<10x1xf32> -> vector<10x1xf32>
    %102 = vector.broadcast %101 : vector<10x1xf32> to vector<10x10xf32>
    %103 = arith.mulf %98, %102 : vector<10x10xf32>
    %104 = arith.truncf %103 : vector<10x10xf32> to vector<10x10xbf16>
    %cst_32 = arith.constant dense<0.000000e+00> : vector<10x8xf32>
    %105 = tpu.matmul %104, %91, %cst_32 {dimension_numbers = #tpu.dot_dimension_numbers<[1], [0], [0], [1], [0, 0, 1, 1], [], []>} : vector<10x10xbf16>, vector<10x8xbf16>, vector<10x8xf32> -> vector<10x8xf32>
    %106 = vector.extract_strided_slice %71 {offsets = [0, 16], sizes = [10, 8], strides = [1, 1]} : vector<10x96xbf16> to vector<10x8xbf16>
    %107 = vector.extract_strided_slice %71 {offsets = [0, 48], sizes = [10, 8], strides = [1, 1]} : vector<10x96xbf16> to vector<10x8xbf16>
    %108 = vector.extract_strided_slice %71 {offsets = [0, 80], sizes = [10, 8], strides = [1, 1]} : vector<10x96xbf16> to vector<10x8xbf16>
    %cst_33 = arith.constant dense<0.000000e+00> : vector<10x10xf32>
    %109 = tpu.matmul %106, %107, %cst_33 {dimension_numbers = #tpu.dot_dimension_numbers<[1], [1], [0], [0], [0, 0, 1, 0], [], []>} : vector<10x8xbf16>, vector<10x8xbf16>, vector<10x10xf32> -> vector<10x10xf32>
    %110 = arith.addf %109, %30 : vector<10x10xf32>
    %cst_34 = arith.constant dense<0xFF800000> : vector<10xf32>
    %111 = vector.multi_reduction <maximumf>, %110, %cst_34 [1] : vector<10x10xf32> to vector<10xf32>
    %112 = vector.shape_cast %111 : vector<10xf32> to vector<10x1xf32>
    %113 = vector.broadcast %112 : vector<10x1xf32> to vector<10x10xf32>
    %114 = arith.subf %110, %113 : vector<10x10xf32>
    %115 = math.exp %114 : vector<10x10xf32>
    %cst_35 = arith.constant dense<0.000000e+00> : vector<10xf32>
    %116 = vector.multi_reduction <add>, %115, %cst_35 [1] : vector<10x10xf32> to vector<10xf32>
    %117 = vector.shape_cast %116 : vector<10xf32> to vector<10x1xf32>
    %118 = tpu.reciprocal %117 {approx = true} : vector<10x1xf32> -> vector<10x1xf32>
    %119 = vector.broadcast %118 : vector<10x1xf32> to vector<10x10xf32>
    %120 = arith.mulf %115, %119 : vector<10x10xf32>
    %121 = arith.truncf %120 : vector<10x10xf32> to vector<10x10xbf16>
    %cst_36 = arith.constant dense<0.000000e+00> : vector<10x8xf32>
    %122 = tpu.matmul %121, %108, %cst_36 {dimension_numbers = #tpu.dot_dimension_numbers<[1], [0], [0], [1], [0, 0, 1, 1], [], []>} : vector<10x10xbf16>, vector<10x8xbf16>, vector<10x8xf32> -> vector<10x8xf32>
    %123 = vector.extract_strided_slice %71 {offsets = [0, 24], sizes = [10, 8], strides = [1, 1]} : vector<10x96xbf16> to vector<10x8xbf16>
    %124 = vector.extract_strided_slice %71 {offsets = [0, 56], sizes = [10, 8], strides = [1, 1]} : vector<10x96xbf16> to vector<10x8xbf16>
    %125 = vector.extract_strided_slice %71 {offsets = [0, 88], sizes = [10, 8], strides = [1, 1]} : vector<10x96xbf16> to vector<10x8xbf16>
    %cst_37 = arith.constant dense<0.000000e+00> : vector<10x10xf32>
    %126 = tpu.matmul %123, %124, %cst_37 {dimension_numbers = #tpu.dot_dimension_numbers<[1], [1], [0], [0], [0, 0, 1, 0], [], []>} : vector<10x8xbf16>, vector<10x8xbf16>, vector<10x10xf32> -> vector<10x10xf32>
    %127 = arith.addf %126, %30 : vector<10x10xf32>
    %cst_38 = arith.constant dense<0xFF800000> : vector<10xf32>
    %128 = vector.multi_reduction <maximumf>, %127, %cst_38 [1] : vector<10x10xf32> to vector<10xf32>
    %129 = vector.shape_cast %128 : vector<10xf32> to vector<10x1xf32>
    %130 = vector.broadcast %129 : vector<10x1xf32> to vector<10x10xf32>
    %131 = arith.subf %127, %130 : vector<10x10xf32>
    %132 = math.exp %131 : vector<10x10xf32>
    %cst_39 = arith.constant dense<0.000000e+00> : vector<10xf32>
    %133 = vector.multi_reduction <add>, %132, %cst_39 [1] : vector<10x10xf32> to vector<10xf32>
    %134 = vector.shape_cast %133 : vector<10xf32> to vector<10x1xf32>
    %135 = tpu.reciprocal %134 {approx = true} : vector<10x1xf32> -> vector<10x1xf32>
    %136 = vector.broadcast %135 : vector<10x1xf32> to vector<10x10xf32>
    %137 = arith.mulf %132, %136 : vector<10x10xf32>
    %138 = arith.truncf %137 : vector<10x10xf32> to vector<10x10xbf16>
    %cst_40 = arith.constant dense<0.000000e+00> : vector<10x8xf32>
    %139 = tpu.matmul %138, %125, %cst_40 {dimension_numbers = #tpu.dot_dimension_numbers<[1], [0], [0], [1], [0, 0, 1, 1], [], []>} : vector<10x10xbf16>, vector<10x8xbf16>, vector<10x8xf32> -> vector<10x8xf32>
    %140 = tpu.concatenate %88, %105, %122, %139 in 1 : vector<10x8xf32>, vector<10x8xf32>, vector<10x8xf32>, vector<10x8xf32> -> vector<10x32xf32>
    %141 = arith.truncf %140 : vector<10x32xf32> to vector<10x32xbf16>
    %c0_41 = arith.constant 0 : index
    %c0_42 = arith.constant 0 : index
    %c0_43 = arith.constant 0 : index
    %142 = vector.load %arg5[%c0_41, %c0_42, %c0_43] : memref<2x32x32xbf16, #tpu.memory_space<vmem>>, vector<1x32x32xbf16>
    %143 = vector.shape_cast %142 : vector<1x32x32xbf16> to vector<32x32xbf16>
    %cst_44 = arith.constant dense<0.000000e+00> : vector<10x32xf32>
    %144 = tpu.matmul %141, %143, %cst_44 {dimension_numbers = #tpu.dot_dimension_numbers<[1], [0], [0], [1], [0, 0, 1, 1], [], []>} : vector<10x32xbf16>, vector<32x32xbf16>, vector<10x32xf32> -> vector<10x32xf32>
    %145 = vector.broadcast %37 : vector<1x32xf32> to vector<10x32xf32>
    %146 = arith.addf %144, %145 : vector<10x32xf32>
    %147 = arith.addf %2, %146 : vector<10x32xf32>
    %cst_45 = arith.constant dense<0.000000e+00> : vector<10xf32>
    %148 = vector.multi_reduction <add>, %147, %cst_45 [1] : vector<10x32xf32> to vector<10xf32>
    %149 = vector.shape_cast %148 : vector<10xf32> to vector<10x1xf32>
    %cst_46 = arith.constant 3.200000e+01 : f32
    %150 = vector.broadcast %cst_46 : f32 to vector<10x1xf32>
    %151 = arith.divf %149, %150 : vector<10x1xf32>
    %152 = vector.broadcast %151 : vector<10x1xf32> to vector<10x32xf32>
    %153 = arith.subf %147, %152 : vector<10x32xf32>
    %154 = vector.broadcast %151 : vector<10x1xf32> to vector<10x32xf32>
    %155 = arith.subf %147, %154 : vector<10x32xf32>
    %156 = arith.mulf %153, %155 : vector<10x32xf32>
    %cst_47 = arith.constant dense<0.000000e+00> : vector<10xf32>
    %157 = vector.multi_reduction <add>, %156, %cst_47 [1] : vector<10x32xf32> to vector<10xf32>
    %158 = vector.shape_cast %157 : vector<10xf32> to vector<10x1xf32>
    %cst_48 = arith.constant 3.200000e+01 : f32
    %159 = vector.broadcast %cst_48 : f32 to vector<10x1xf32>
    %160 = arith.divf %158, %159 : vector<10x1xf32>
    %161 = vector.broadcast %151 : vector<10x1xf32> to vector<10x32xf32>
    %162 = arith.subf %147, %161 : vector<10x32xf32>
    %cst_49 = arith.constant 9.99999997E-7 : f32
    %163 = vector.broadcast %cst_49 : f32 to vector<10x1xf32>
    %164 = arith.addf %160, %163 : vector<10x1xf32>
    %165 = math.rsqrt %164 : vector<10x1xf32>
    %166 = vector.broadcast %165 : vector<10x1xf32> to vector<10x32xf32>
    %167 = arith.mulf %162, %166 : vector<10x32xf32>
    %168 = vector.broadcast %35 : vector<1x32xf32> to vector<10x32xf32>
    %169 = arith.mulf %167, %168 : vector<10x32xf32>
    %170 = vector.broadcast %36 : vector<1x32xf32> to vector<10x32xf32>
    %171 = arith.addf %169, %170 : vector<10x32xf32>
    %172 = arith.truncf %171 : vector<10x32xf32> to vector<10x32xbf16>
    %c0_50 = arith.constant 0 : index
    %c0_51 = arith.constant 0 : index
    %c0_52 = arith.constant 0 : index
    %173 = vector.load %arg6[%c0_50, %c0_51, %c0_52] : memref<2x32x64xbf16, #tpu.memory_space<vmem>>, vector<1x32x64xbf16>
    %174 = vector.shape_cast %173 : vector<1x32x64xbf16> to vector<32x64xbf16>
    %cst_53 = arith.constant dense<0.000000e+00> : vector<10x64xf32>
    %175 = tpu.matmul %172, %174, %cst_53 {dimension_numbers = #tpu.dot_dimension_numbers<[1], [0], [0], [1], [0, 0, 1, 1], [], []>} : vector<10x32xbf16>, vector<32x64xbf16>, vector<10x64xf32> -> vector<10x64xf32>
    %c0_54 = arith.constant 0 : index
    %c0_55 = arith.constant 0 : index
    %c0_56 = arith.constant 0 : index
    %176 = vector.load %arg7[%c0_54, %c0_55, %c0_56] : memref<2x1x64xf32, #tpu.memory_space<vmem>>, vector<1x1x64xf32>
    %177 = vector.shape_cast %176 : vector<1x1x64xf32> to vector<1x64xf32>
    %178 = vector.broadcast %177 : vector<1x64xf32> to vector<10x64xf32>
    %179 = arith.addf %175, %178 : vector<10x64xf32>
    %cst_57 = arith.constant 5.000000e-01 : f32
    %180 = vector.broadcast %cst_57 : f32 to vector<10x64xf32>
    %181 = arith.mulf %180, %179 : vector<10x64xf32>
    %cst_58 = arith.constant 0.707106769 : f32
    %182 = vector.broadcast %cst_58 : f32 to vector<10x64xf32>
    %183 = arith.mulf %179, %182 : vector<10x64xf32>
    %184 = math.erf %183 : vector<10x64xf32>
    %cst_59 = arith.constant 1.000000e+00 : f32
    %185 = vector.broadcast %cst_59 : f32 to vector<10x64xf32>
    %186 = arith.addf %185, %184 : vector<10x64xf32>
    %187 = arith.mulf %181, %186 : vector<10x64xf32>
    %188 = arith.truncf %187 : vector<10x64xf32> to vector<10x64xbf16>
    %c0_60 = arith.constant 0 : index
    %c0_61 = arith.constant 0 : index
    %c0_62 = arith.constant 0 : index
    %189 = vector.load %arg8[%c0_60, %c0_61, %c0_62] : memref<2x64x32xbf16, #tpu.memory_space<vmem>>, vector<1x64x32xbf16>
    %190 = vector.shape_cast %189 : vector<1x64x32xbf16> to vector<64x32xbf16>
    %cst_63 = arith.constant dense<0.000000e+00> : vector<10x32xf32>
    %191 = tpu.matmul %188, %190, %cst_63 {dimension_numbers = #tpu.dot_dimension_numbers<[1], [0], [0], [1], [0, 0, 1, 1], [], []>} : vector<10x64xbf16>, vector<64x32xbf16>, vector<10x32xf32> -> vector<10x32xf32>
    %192 = vector.broadcast %38 : vector<1x32xf32> to vector<10x32xf32>
    %193 = arith.addf %191, %192 : vector<10x32xf32>
    %194 = arith.addf %147, %193 : vector<10x32xf32>
    %c1 = arith.constant 1 : index
    %c0_64 = arith.constant 0 : index
    %c0_65 = arith.constant 0 : index
    %195 = vector.load %arg2[%c1, %c0_64, %c0_65] : memref<2x6x32xf32, #tpu.memory_space<vmem>>, vector<1x6x32xf32>
    %196 = vector.shape_cast %195 : vector<1x6x32xf32> to vector<6x32xf32>
    %197 = vector.extract_strided_slice %196 {offsets = [0, 0], sizes = [1, 32], strides = [1, 1]} : vector<6x32xf32> to vector<1x32xf32>
    %198 = vector.extract_strided_slice %196 {offsets = [1, 0], sizes = [1, 32], strides = [1, 1]} : vector<6x32xf32> to vector<1x32xf32>
    %199 = vector.extract_strided_slice %196 {offsets = [2, 0], sizes = [1, 32], strides = [1, 1]} : vector<6x32xf32> to vector<1x32xf32>
    %200 = vector.extract_strided_slice %196 {offsets = [3, 0], sizes = [1, 32], strides = [1, 1]} : vector<6x32xf32> to vector<1x32xf32>
    %201 = vector.extract_strided_slice %196 {offsets = [4, 0], sizes = [1, 32], strides = [1, 1]} : vector<6x32xf32> to vector<1x32xf32>
    %202 = vector.extract_strided_slice %196 {offsets = [5, 0], sizes = [1, 32], strides = [1, 1]} : vector<6x32xf32> to vector<1x32xf32>
    %cst_66 = arith.constant dense<0.000000e+00> : vector<10xf32>
    %203 = vector.multi_reduction <add>, %194, %cst_66 [1] : vector<10x32xf32> to vector<10xf32>
    %204 = vector.shape_cast %203 : vector<10xf32> to vector<10x1xf32>
    %cst_67 = arith.constant 3.200000e+01 : f32
    %205 = vector.broadcast %cst_67 : f32 to vector<10x1xf32>
    %206 = arith.divf %204, %205 : vector<10x1xf32>
    %207 = vector.broadcast %206 : vector<10x1xf32> to vector<10x32xf32>
    %208 = arith.subf %194, %207 : vector<10x32xf32>
    %209 = vector.broadcast %206 : vector<10x1xf32> to vector<10x32xf32>
    %210 = arith.subf %194, %209 : vector<10x32xf32>
    %211 = arith.mulf %208, %210 : vector<10x32xf32>
    %cst_68 = arith.constant dense<0.000000e+00> : vector<10xf32>
    %212 = vector.multi_reduction <add>, %211, %cst_68 [1] : vector<10x32xf32> to vector<10xf32>
    %213 = vector.shape_cast %212 : vector<10xf32> to vector<10x1xf32>
    %cst_69 = arith.constant 3.200000e+01 : f32
    %214 = vector.broadcast %cst_69 : f32 to vector<10x1xf32>
    %215 = arith.divf %213, %214 : vector<10x1xf32>
    %216 = vector.broadcast %206 : vector<10x1xf32> to vector<10x32xf32>
    %217 = arith.subf %194, %216 : vector<10x32xf32>
    %cst_70 = arith.constant 9.99999997E-7 : f32
    %218 = vector.broadcast %cst_70 : f32 to vector<10x1xf32>
    %219 = arith.addf %215, %218 : vector<10x1xf32>
    %220 = math.rsqrt %219 : vector<10x1xf32>
    %221 = vector.broadcast %220 : vector<10x1xf32> to vector<10x32xf32>
    %222 = arith.mulf %217, %221 : vector<10x32xf32>
    %223 = vector.broadcast %197 : vector<1x32xf32> to vector<10x32xf32>
    %224 = arith.mulf %222, %223 : vector<10x32xf32>
    %225 = vector.broadcast %198 : vector<1x32xf32> to vector<10x32xf32>
    %226 = arith.addf %224, %225 : vector<10x32xf32>
    %227 = arith.truncf %226 : vector<10x32xf32> to vector<10x32xbf16>
    %c1_71 = arith.constant 1 : index
    %c0_72 = arith.constant 0 : index
    %c0_73 = arith.constant 0 : index
    %228 = vector.load %arg3[%c1_71, %c0_72, %c0_73] : memref<2x32x96xbf16, #tpu.memory_space<vmem>>, vector<1x32x96xbf16>
    %229 = vector.shape_cast %228 : vector<1x32x96xbf16> to vector<32x96xbf16>
    %cst_74 = arith.constant dense<0.000000e+00> : vector<10x96xf32>
    %230 = tpu.matmul %227, %229, %cst_74 {dimension_numbers = #tpu.dot_dimension_numbers<[1], [0], [0], [1], [0, 0, 1, 1], [], []>} : vector<10x32xbf16>, vector<32x96xbf16>, vector<10x96xf32> -> vector<10x96xf32>
    %c1_75 = arith.constant 1 : index
    %c0_76 = arith.constant 0 : index
    %c0_77 = arith.constant 0 : index
    %231 = vector.load %arg4[%c1_75, %c0_76, %c0_77] : memref<2x1x96xf32, #tpu.memory_space<vmem>>, vector<1x1x96xf32>
    %232 = vector.shape_cast %231 : vector<1x1x96xf32> to vector<1x96xf32>
    %233 = vector.broadcast %232 : vector<1x96xf32> to vector<10x96xf32>
    %234 = arith.addf %230, %233 : vector<10x96xf32>
    %235 = arith.truncf %234 : vector<10x96xf32> to vector<10x96xbf16>
    %236 = vector.extract_strided_slice %235 {offsets = [0, 0], sizes = [10, 8], strides = [1, 1]} : vector<10x96xbf16> to vector<10x8xbf16>
    %237 = vector.extract_strided_slice %235 {offsets = [0, 32], sizes = [10, 8], strides = [1, 1]} : vector<10x96xbf16> to vector<10x8xbf16>
    %238 = vector.extract_strided_slice %235 {offsets = [0, 64], sizes = [10, 8], strides = [1, 1]} : vector<10x96xbf16> to vector<10x8xbf16>
    %cst_78 = arith.constant dense<0.000000e+00> : vector<10x10xf32>
    %239 = tpu.matmul %236, %237, %cst_78 {dimension_numbers = #tpu.dot_dimension_numbers<[1], [1], [0], [0], [0, 0, 1, 0], [], []>} : vector<10x8xbf16>, vector<10x8xbf16>, vector<10x10xf32> -> vector<10x10xf32>
    %240 = arith.addf %239, %30 : vector<10x10xf32>
    %cst_79 = arith.constant dense<0xFF800000> : vector<10xf32>
    %241 = vector.multi_reduction <maximumf>, %240, %cst_79 [1] : vector<10x10xf32> to vector<10xf32>
    %242 = vector.shape_cast %241 : vector<10xf32> to vector<10x1xf32>
    %243 = vector.broadcast %242 : vector<10x1xf32> to vector<10x10xf32>
    %244 = arith.subf %240, %243 : vector<10x10xf32>
    %245 = math.exp %244 : vector<10x10xf32>
    %cst_80 = arith.constant dense<0.000000e+00> : vector<10xf32>
    %246 = vector.multi_reduction <add>, %245, %cst_80 [1] : vector<10x10xf32> to vector<10xf32>
    %247 = vector.shape_cast %246 : vector<10xf32> to vector<10x1xf32>
    %248 = tpu.reciprocal %247 {approx = true} : vector<10x1xf32> -> vector<10x1xf32>
    %249 = vector.broadcast %248 : vector<10x1xf32> to vector<10x10xf32>
    %250 = arith.mulf %245, %249 : vector<10x10xf32>
    %251 = arith.truncf %250 : vector<10x10xf32> to vector<10x10xbf16>
    %cst_81 = arith.constant dense<0.000000e+00> : vector<10x8xf32>
    %252 = tpu.matmul %251, %238, %cst_81 {dimension_numbers = #tpu.dot_dimension_numbers<[1], [0], [0], [1], [0, 0, 1, 1], [], []>} : vector<10x10xbf16>, vector<10x8xbf16>, vector<10x8xf32> -> vector<10x8xf32>
    %253 = vector.extract_strided_slice %235 {offsets = [0, 8], sizes = [10, 8], strides = [1, 1]} : vector<10x96xbf16> to vector<10x8xbf16>
    %254 = vector.extract_strided_slice %235 {offsets = [0, 40], sizes = [10, 8], strides = [1, 1]} : vector<10x96xbf16> to vector<10x8xbf16>
    %255 = vector.extract_strided_slice %235 {offsets = [0, 72], sizes = [10, 8], strides = [1, 1]} : vector<10x96xbf16> to vector<10x8xbf16>
    %cst_82 = arith.constant dense<0.000000e+00> : vector<10x10xf32>
    %256 = tpu.matmul %253, %254, %cst_82 {dimension_numbers = #tpu.dot_dimension_numbers<[1], [1], [0], [0], [0, 0, 1, 0], [], []>} : vector<10x8xbf16>, vector<10x8xbf16>, vector<10x10xf32> -> vector<10x10xf32>
    %257 = arith.addf %256, %30 : vector<10x10xf32>
    %cst_83 = arith.constant dense<0xFF800000> : vector<10xf32>
    %258 = vector.multi_reduction <maximumf>, %257, %cst_83 [1] : vector<10x10xf32> to vector<10xf32>
    %259 = vector.shape_cast %258 : vector<10xf32> to vector<10x1xf32>
    %260 = vector.broadcast %259 : vector<10x1xf32> to vector<10x10xf32>
    %261 = arith.subf %257, %260 : vector<10x10xf32>
    %262 = math.exp %261 : vector<10x10xf32>
    %cst_84 = arith.constant dense<0.000000e+00> : vector<10xf32>
    %263 = vector.multi_reduction <add>, %262, %cst_84 [1] : vector<10x10xf32> to vector<10xf32>
    %264 = vector.shape_cast %263 : vector<10xf32> to vector<10x1xf32>
    %265 = tpu.reciprocal %264 {approx = true} : vector<10x1xf32> -> vector<10x1xf32>
    %266 = vector.broadcast %265 : vector<10x1xf32> to vector<10x10xf32>
    %267 = arith.mulf %262, %266 : vector<10x10xf32>
    %268 = arith.truncf %267 : vector<10x10xf32> to vector<10x10xbf16>
    %cst_85 = arith.constant dense<0.000000e+00> : vector<10x8xf32>
    %269 = tpu.matmul %268, %255, %cst_85 {dimension_numbers = #tpu.dot_dimension_numbers<[1], [0], [0], [1], [0, 0, 1, 1], [], []>} : vector<10x10xbf16>, vector<10x8xbf16>, vector<10x8xf32> -> vector<10x8xf32>
    %270 = vector.extract_strided_slice %235 {offsets = [0, 16], sizes = [10, 8], strides = [1, 1]} : vector<10x96xbf16> to vector<10x8xbf16>
    %271 = vector.extract_strided_slice %235 {offsets = [0, 48], sizes = [10, 8], strides = [1, 1]} : vector<10x96xbf16> to vector<10x8xbf16>
    %272 = vector.extract_strided_slice %235 {offsets = [0, 80], sizes = [10, 8], strides = [1, 1]} : vector<10x96xbf16> to vector<10x8xbf16>
    %cst_86 = arith.constant dense<0.000000e+00> : vector<10x10xf32>
    %273 = tpu.matmul %270, %271, %cst_86 {dimension_numbers = #tpu.dot_dimension_numbers<[1], [1], [0], [0], [0, 0, 1, 0], [], []>} : vector<10x8xbf16>, vector<10x8xbf16>, vector<10x10xf32> -> vector<10x10xf32>
    %274 = arith.addf %273, %30 : vector<10x10xf32>
    %cst_87 = arith.constant dense<0xFF800000> : vector<10xf32>
    %275 = vector.multi_reduction <maximumf>, %274, %cst_87 [1] : vector<10x10xf32> to vector<10xf32>
    %276 = vector.shape_cast %275 : vector<10xf32> to vector<10x1xf32>
    %277 = vector.broadcast %276 : vector<10x1xf32> to vector<10x10xf32>
    %278 = arith.subf %274, %277 : vector<10x10xf32>
    %279 = math.exp %278 : vector<10x10xf32>
    %cst_88 = arith.constant dense<0.000000e+00> : vector<10xf32>
    %280 = vector.multi_reduction <add>, %279, %cst_88 [1] : vector<10x10xf32> to vector<10xf32>
    %281 = vector.shape_cast %280 : vector<10xf32> to vector<10x1xf32>
    %282 = tpu.reciprocal %281 {approx = true} : vector<10x1xf32> -> vector<10x1xf32>
    %283 = vector.broadcast %282 : vector<10x1xf32> to vector<10x10xf32>
    %284 = arith.mulf %279, %283 : vector<10x10xf32>
    %285 = arith.truncf %284 : vector<10x10xf32> to vector<10x10xbf16>
    %cst_89 = arith.constant dense<0.000000e+00> : vector<10x8xf32>
    %286 = tpu.matmul %285, %272, %cst_89 {dimension_numbers = #tpu.dot_dimension_numbers<[1], [0], [0], [1], [0, 0, 1, 1], [], []>} : vector<10x10xbf16>, vector<10x8xbf16>, vector<10x8xf32> -> vector<10x8xf32>
    %287 = vector.extract_strided_slice %235 {offsets = [0, 24], sizes = [10, 8], strides = [1, 1]} : vector<10x96xbf16> to vector<10x8xbf16>
    %288 = vector.extract_strided_slice %235 {offsets = [0, 56], sizes = [10, 8], strides = [1, 1]} : vector<10x96xbf16> to vector<10x8xbf16>
    %289 = vector.extract_strided_slice %235 {offsets = [0, 88], sizes = [10, 8], strides = [1, 1]} : vector<10x96xbf16> to vector<10x8xbf16>
    %cst_90 = arith.constant dense<0.000000e+00> : vector<10x10xf32>
    %290 = tpu.matmul %287, %288, %cst_90 {dimension_numbers = #tpu.dot_dimension_numbers<[1], [1], [0], [0], [0, 0, 1, 0], [], []>} : vector<10x8xbf16>, vector<10x8xbf16>, vector<10x10xf32> -> vector<10x10xf32>
    %291 = arith.addf %290, %30 : vector<10x10xf32>
    %cst_91 = arith.constant dense<0xFF800000> : vector<10xf32>
    %292 = vector.multi_reduction <maximumf>, %291, %cst_91 [1] : vector<10x10xf32> to vector<10xf32>
    %293 = vector.shape_cast %292 : vector<10xf32> to vector<10x1xf32>
    %294 = vector.broadcast %293 : vector<10x1xf32> to vector<10x10xf32>
    %295 = arith.subf %291, %294 : vector<10x10xf32>
    %296 = math.exp %295 : vector<10x10xf32>
    %cst_92 = arith.constant dense<0.000000e+00> : vector<10xf32>
    %297 = vector.multi_reduction <add>, %296, %cst_92 [1] : vector<10x10xf32> to vector<10xf32>
    %298 = vector.shape_cast %297 : vector<10xf32> to vector<10x1xf32>
    %299 = tpu.reciprocal %298 {approx = true} : vector<10x1xf32> -> vector<10x1xf32>
    %300 = vector.broadcast %299 : vector<10x1xf32> to vector<10x10xf32>
    %301 = arith.mulf %296, %300 : vector<10x10xf32>
    %302 = arith.truncf %301 : vector<10x10xf32> to vector<10x10xbf16>
    %cst_93 = arith.constant dense<0.000000e+00> : vector<10x8xf32>
    %303 = tpu.matmul %302, %289, %cst_93 {dimension_numbers = #tpu.dot_dimension_numbers<[1], [0], [0], [1], [0, 0, 1, 1], [], []>} : vector<10x10xbf16>, vector<10x8xbf16>, vector<10x8xf32> -> vector<10x8xf32>
    %304 = tpu.concatenate %252, %269, %286, %303 in 1 : vector<10x8xf32>, vector<10x8xf32>, vector<10x8xf32>, vector<10x8xf32> -> vector<10x32xf32>
    %305 = arith.truncf %304 : vector<10x32xf32> to vector<10x32xbf16>
    %c1_94 = arith.constant 1 : index
    %c0_95 = arith.constant 0 : index
    %c0_96 = arith.constant 0 : index
    %306 = vector.load %arg5[%c1_94, %c0_95, %c0_96] : memref<2x32x32xbf16, #tpu.memory_space<vmem>>, vector<1x32x32xbf16>
    %307 = vector.shape_cast %306 : vector<1x32x32xbf16> to vector<32x32xbf16>
    %cst_97 = arith.constant dense<0.000000e+00> : vector<10x32xf32>
    %308 = tpu.matmul %305, %307, %cst_97 {dimension_numbers = #tpu.dot_dimension_numbers<[1], [0], [0], [1], [0, 0, 1, 1], [], []>} : vector<10x32xbf16>, vector<32x32xbf16>, vector<10x32xf32> -> vector<10x32xf32>
    %309 = vector.broadcast %201 : vector<1x32xf32> to vector<10x32xf32>
    %310 = arith.addf %308, %309 : vector<10x32xf32>
    %311 = arith.addf %194, %310 : vector<10x32xf32>
    %cst_98 = arith.constant dense<0.000000e+00> : vector<10xf32>
    %312 = vector.multi_reduction <add>, %311, %cst_98 [1] : vector<10x32xf32> to vector<10xf32>
    %313 = vector.shape_cast %312 : vector<10xf32> to vector<10x1xf32>
    %cst_99 = arith.constant 3.200000e+01 : f32
    %314 = vector.broadcast %cst_99 : f32 to vector<10x1xf32>
    %315 = arith.divf %313, %314 : vector<10x1xf32>
    %316 = vector.broadcast %315 : vector<10x1xf32> to vector<10x32xf32>
    %317 = arith.subf %311, %316 : vector<10x32xf32>
    %318 = vector.broadcast %315 : vector<10x1xf32> to vector<10x32xf32>
    %319 = arith.subf %311, %318 : vector<10x32xf32>
    %320 = arith.mulf %317, %319 : vector<10x32xf32>
    %cst_100 = arith.constant dense<0.000000e+00> : vector<10xf32>
    %321 = vector.multi_reduction <add>, %320, %cst_100 [1] : vector<10x32xf32> to vector<10xf32>
    %322 = vector.shape_cast %321 : vector<10xf32> to vector<10x1xf32>
    %cst_101 = arith.constant 3.200000e+01 : f32
    %323 = vector.broadcast %cst_101 : f32 to vector<10x1xf32>
    %324 = arith.divf %322, %323 : vector<10x1xf32>
    %325 = vector.broadcast %315 : vector<10x1xf32> to vector<10x32xf32>
    %326 = arith.subf %311, %325 : vector<10x32xf32>
    %cst_102 = arith.constant 9.99999997E-7 : f32
    %327 = vector.broadcast %cst_102 : f32 to vector<10x1xf32>
    %328 = arith.addf %324, %327 : vector<10x1xf32>
    %329 = math.rsqrt %328 : vector<10x1xf32>
    %330 = vector.broadcast %329 : vector<10x1xf32> to vector<10x32xf32>
    %331 = arith.mulf %326, %330 : vector<10x32xf32>
    %332 = vector.broadcast %199 : vector<1x32xf32> to vector<10x32xf32>
    %333 = arith.mulf %331, %332 : vector<10x32xf32>
    %334 = vector.broadcast %200 : vector<1x32xf32> to vector<10x32xf32>
    %335 = arith.addf %333, %334 : vector<10x32xf32>
    %336 = arith.truncf %335 : vector<10x32xf32> to vector<10x32xbf16>
    %c1_103 = arith.constant 1 : index
    %c0_104 = arith.constant 0 : index
    %c0_105 = arith.constant 0 : index
    %337 = vector.load %arg6[%c1_103, %c0_104, %c0_105] : memref<2x32x64xbf16, #tpu.memory_space<vmem>>, vector<1x32x64xbf16>
    %338 = vector.shape_cast %337 : vector<1x32x64xbf16> to vector<32x64xbf16>
    %cst_106 = arith.constant dense<0.000000e+00> : vector<10x64xf32>
    %339 = tpu.matmul %336, %338, %cst_106 {dimension_numbers = #tpu.dot_dimension_numbers<[1], [0], [0], [1], [0, 0, 1, 1], [], []>} : vector<10x32xbf16>, vector<32x64xbf16>, vector<10x64xf32> -> vector<10x64xf32>
    %c1_107 = arith.constant 1 : index
    %c0_108 = arith.constant 0 : index
    %c0_109 = arith.constant 0 : index
    %340 = vector.load %arg7[%c1_107, %c0_108, %c0_109] : memref<2x1x64xf32, #tpu.memory_space<vmem>>, vector<1x1x64xf32>
    %341 = vector.shape_cast %340 : vector<1x1x64xf32> to vector<1x64xf32>
    %342 = vector.broadcast %341 : vector<1x64xf32> to vector<10x64xf32>
    %343 = arith.addf %339, %342 : vector<10x64xf32>
    %cst_110 = arith.constant 5.000000e-01 : f32
    %344 = vector.broadcast %cst_110 : f32 to vector<10x64xf32>
    %345 = arith.mulf %344, %343 : vector<10x64xf32>
    %cst_111 = arith.constant 0.707106769 : f32
    %346 = vector.broadcast %cst_111 : f32 to vector<10x64xf32>
    %347 = arith.mulf %343, %346 : vector<10x64xf32>
    %348 = math.erf %347 : vector<10x64xf32>
    %cst_112 = arith.constant 1.000000e+00 : f32
    %349 = vector.broadcast %cst_112 : f32 to vector<10x64xf32>
    %350 = arith.addf %349, %348 : vector<10x64xf32>
    %351 = arith.mulf %345, %350 : vector<10x64xf32>
    %352 = arith.truncf %351 : vector<10x64xf32> to vector<10x64xbf16>
    %c1_113 = arith.constant 1 : index
    %c0_114 = arith.constant 0 : index
    %c0_115 = arith.constant 0 : index
    %353 = vector.load %arg8[%c1_113, %c0_114, %c0_115] : memref<2x64x32xbf16, #tpu.memory_space<vmem>>, vector<1x64x32xbf16>
    %354 = vector.shape_cast %353 : vector<1x64x32xbf16> to vector<64x32xbf16>
    %cst_116 = arith.constant dense<0.000000e+00> : vector<10x32xf32>
    %355 = tpu.matmul %352, %354, %cst_116 {dimension_numbers = #tpu.dot_dimension_numbers<[1], [0], [0], [1], [0, 0, 1, 1], [], []>} : vector<10x64xbf16>, vector<64x32xbf16>, vector<10x32xf32> -> vector<10x32xf32>
    %356 = vector.broadcast %202 : vector<1x32xf32> to vector<10x32xf32>
    %357 = arith.addf %355, %356 : vector<10x32xf32>
    %358 = arith.addf %311, %357 : vector<10x32xf32>
    %359 = vector.extract_strided_slice %358 {offsets = [0, 0], sizes = [1, 32], strides = [1, 1]} : vector<10x32xf32> to vector<1x32xf32>
    %360 = vector.extract_strided_slice %358 {offsets = [5, 0], sizes = [1, 32], strides = [1, 1]} : vector<10x32xf32> to vector<1x32xf32>
    %361 = tpu.concatenate %359, %360 in 0 : vector<1x32xf32>, vector<1x32xf32> -> vector<2x32xf32>
    %c0_117 = arith.constant 0 : index
    %c0_118 = arith.constant 0 : index
    %362 = vector.load %arg9[%c0_117, %c0_118] : memref<2x32xf32, #tpu.memory_space<vmem>>, vector<1x32xf32>
    %c1_119 = arith.constant 1 : index
    %c0_120 = arith.constant 0 : index
    %363 = vector.load %arg9[%c1_119, %c0_120] : memref<2x32xf32, #tpu.memory_space<vmem>>, vector<1x32xf32>
    %cst_121 = arith.constant dense<0.000000e+00> : vector<2xf32>
    %364 = vector.multi_reduction <add>, %361, %cst_121 [1] : vector<2x32xf32> to vector<2xf32>
    %365 = vector.shape_cast %364 : vector<2xf32> to vector<2x1xf32>
    %cst_122 = arith.constant 3.200000e+01 : f32
    %366 = vector.broadcast %cst_122 : f32 to vector<2x1xf32>
    %367 = arith.divf %365, %366 : vector<2x1xf32>
    %368 = vector.broadcast %367 : vector<2x1xf32> to vector<2x32xf32>
    %369 = arith.subf %361, %368 : vector<2x32xf32>
    %370 = vector.broadcast %367 : vector<2x1xf32> to vector<2x32xf32>
    %371 = arith.subf %361, %370 : vector<2x32xf32>
    %372 = arith.mulf %369, %371 : vector<2x32xf32>
    %cst_123 = arith.constant dense<0.000000e+00> : vector<2xf32>
    %373 = vector.multi_reduction <add>, %372, %cst_123 [1] : vector<2x32xf32> to vector<2xf32>
    %374 = vector.shape_cast %373 : vector<2xf32> to vector<2x1xf32>
    %cst_124 = arith.constant 3.200000e+01 : f32
    %375 = vector.broadcast %cst_124 : f32 to vector<2x1xf32>
    %376 = arith.divf %374, %375 : vector<2x1xf32>
    %377 = vector.broadcast %367 : vector<2x1xf32> to vector<2x32xf32>
    %378 = arith.subf %361, %377 : vector<2x32xf32>
    %cst_125 = arith.constant 9.99999997E-7 : f32
    %379 = vector.broadcast %cst_125 : f32 to vector<2x1xf32>
    %380 = arith.addf %376, %379 : vector<2x1xf32>
    %381 = math.rsqrt %380 : vector<2x1xf32>
    %382 = vector.broadcast %381 : vector<2x1xf32> to vector<2x32xf32>
    %383 = arith.mulf %378, %382 : vector<2x32xf32>
    %384 = vector.broadcast %362 : vector<1x32xf32> to vector<2x32xf32>
    %385 = arith.mulf %383, %384 : vector<2x32xf32>
    %386 = vector.broadcast %363 : vector<1x32xf32> to vector<2x32xf32>
    %387 = arith.addf %385, %386 : vector<2x32xf32>
    %388 = arith.truncf %387 : vector<2x32xf32> to vector<2x32xbf16>
    %c0_126 = arith.constant 0 : index
    %c0_127 = arith.constant 0 : index
    %389 = vector.load %arg10[%c0_126, %c0_127] : memref<32x10xbf16, #tpu.memory_space<vmem>>, vector<32x10xbf16>
    %cst_128 = arith.constant dense<0.000000e+00> : vector<2x10xf32>
    %390 = tpu.matmul %388, %389, %cst_128 {dimension_numbers = #tpu.dot_dimension_numbers<[1], [0], [0], [1], [0, 0, 1, 1], [], []>} : vector<2x32xbf16>, vector<32x10xbf16>, vector<2x10xf32> -> vector<2x10xf32>
    %c0_129 = arith.constant 0 : index
    %c0_130 = arith.constant 0 : index
    %391 = vector.load %arg11[%c0_129, %c0_130] : memref<1x10xf32, #tpu.memory_space<vmem>>, vector<1x10xf32>
    %392 = vector.broadcast %391 : vector<1x10xf32> to vector<2x10xf32>
    %393 = arith.addf %390, %392 : vector<2x10xf32>
    %c0_131 = arith.constant 0 : index
    %c0_132 = arith.constant 0 : index
    %394 = vector.load %arg12[%c0_131, %c0_132] : memref<2x10xf32, #tpu.memory_space<vmem>>, vector<2x10xf32>
    tpu.vector_store %arg12[%c0_131, %c0_132], %393 {strides = array<i32>} : memref<2x10xf32, #tpu.memory_space<vmem>>, vector<2x10xf32>,
    return
  }
}

</mosaic_0001>

<bundles_post_ra>
// kernel: vit_forward.1
= control target key start
LH: loop header
LB: loop body
LE: loop exit
PB: predicated region body
PF: predicated region fallthrough
CT: control target
= control target key end

     0   :  { %s3352_s0 = inlined_call_operand.vmem [shape: bf16[10,780], index: 0, kind: input, shape index: {}]   ;;  %s3353_s1 = inlined_call_operand.vmem [shape: bf16[780,32], index: 1, kind: input, shape index: {}]   ;;  %s3354_s2 = inlined_call_operand.vmem [shape: f32[2,6,32], index: 2, kind: input, shape index: {}]   ;;  %s3355_s3 = inlined_call_operand.vmem [shape: bf16[2,32,96], index: 3, kind: input, shape index: {}]   ;;  %s3356_s4 = inlined_call_operand.vmem [shape: f32[2,1,96], index: 4, kind: input, shape index: {}]   ;;  %s3357_s5 = inlined_call_operand.vmem [shape: bf16[2,32,32], index: 5, kind: input, shape index: {}]   ;;  %s3358_s6 = inlined_call_operand.vmem [shape: bf16[2,32,64], index: 6, kind: input, shape index: {}]   ;;  %s3359_s7 = inlined_call_operand.vmem [shape: f32[2,1,64], index: 7, kind: input, shape index: {}]   ;;  %s3360_s8 = inlined_call_operand.vmem [shape: bf16[2,64,32], index: 8, kind: input, shape index: {}]   ;;  %s3361_s9 = inlined_call_operand.vmem [shape: f32[2,32], index: 9, kind: input, shape index: {}]   ;;  %s3362_s10 = inlined_call_operand.vmem [shape: bf16[32,10], index: 10, kind: input, shape index: {}]   ;;  %s3363_s11 = inlined_call_operand.vmem [shape: f32[1,10], index: 11, kind: input, shape index: {}]   ;;  %s3364_s12 = inlined_call_operand.hbm [shape: f32[2,10], index: 12, kind: output, shape index: {}]  }
   0x1   :  { %v2435_v0 = vld [vmem:[%s3353_s1 + $0x38] sm:$0xff]  ;;  %v2434_v4 = vld [vmem:[%s3353_s1 + $0x30] sm:$0xff]  ;;  %v2433_v8 = vld [vmem:[%s3353_s1 + $0x28] sm:$0xff] }
   0x2   :  { %v2443_v1 = vld [vmem:[%s3353_s1 + $0x78] sm:$0xff]  ;;  %485 = vmatpush.bf16.msra.mxu0 %v2435_v0  ;;  %v2442_v5 = vld [vmem:[%s3353_s1 + $0x70] sm:$0xff]  ;;  %v2441_v9 = vld [vmem:[%s3353_s1 + $0x68] sm:$0xff] }
   0x3   :  { %v2451_v2 = vld [vmem:[%s3353_s1 + $0xb8] sm:$0xff]  ;;  %499 = vmatpush.bf16.msra.mxu1 %v2443_v1  ;;  %v2450_v6 = vld [vmem:[%s3353_s1 + $0xb0] sm:$0xff]  ;;  %v2449_v10 = vld [vmem:[%s3353_s1 + $0xa8] sm:$0xff] }
   0x4   :  { %v2459_v3 = vld [vmem:[%s3353_s1 + $0xf8] sm:$0xff]  ;;  %513 = vmatpush.bf16.msra.mxu2 %v2451_v2  ;;  %v2458_v7 = vld [vmem:[%s3353_s1 + $0xf0] sm:$0xff]  ;;  %v2457_v11 = vld [vmem:[%s3353_s1 + $0xe8] sm:$0xff] }
   0x5   :  { %527 = vmatpush.bf16.msra.mxu3 %v2459_v3  ;;  %v2432_v12 = vld [vmem:[%s3353_s1 + $0x20] sm:$0xff]  ;;  %v2431_v16 = vld [vmem:[%s3353_s1 + $0x18] sm:$0xff]  ;;  %v2430_v20 = vld [vmem:[%s3353_s1 + $0x10] sm:$0xff] }
   0x6   :  { %486 = vmatpush.bf16.msra.mxu0 %v2434_v4  ;;  %v2440_v13 = vld [vmem:[%s3353_s1 + $0x60] sm:$0xff]  ;;  %v2439_v17 = vld [vmem:[%s3353_s1 + $0x58] sm:$0xff]  ;;  %v2438_v21 = vld [vmem:[%s3353_s1 + $0x50] sm:$0xff] }
   0x7   :  { %500 = vmatpush.bf16.msra.mxu1 %v2442_v5  ;;  %v2448_v14 = vld [vmem:[%s3353_s1 + $0xa0] sm:$0xff]  ;;  %v2447_v18 = vld [vmem:[%s3353_s1 + $0x98] sm:$0xff]  ;;  %v2446_v22 = vld [vmem:[%s3353_s1 + $0x90] sm:$0xff] }
   0x8   :  { %514 = vmatpush.bf16.msra.mxu2 %v2450_v6  ;;  %v2456_v15 = vld [vmem:[%s3353_s1 + $0xe0] sm:$0xff]  ;;  %v2455_v19 = vld [vmem:[%s3353_s1 + $0xd8] sm:$0xff]  ;;  %v2454_v23 = vld [vmem:[%s3353_s1 + $0xd0] sm:$0xff] }
   0x9   :  { %528 = vmatpush.bf16.msra.mxu3 %v2458_v7 }
   0xa   :  { %487 = vmatpush.bf16.msra.mxu0 %v2433_v8 }
   0xb   :  { %501 = vmatpush.bf16.msra.mxu1 %v2441_v9 }
   0xc   :  { %515 = vmatpush.bf16.msra.mxu2 %v2449_v10 }
   0xd   :  { %529 = vmatpush.bf16.msra.mxu3 %v2457_v11 }
   0xe   :  { %488 = vmatpush.bf16.msra.mxu0 %v2432_v12 }
   0xf   :  { %502 = vmatpush.bf16.msra.mxu1 %v2440_v13 }
  0x10   :  { %516 = vmatpush.bf16.msra.mxu2 %v2448_v14 }
  0x11   :  { %530 = vmatpush.bf16.msra.mxu3 %v2456_v15 }
  0x12   :  { %489 = vmatpush.bf16.msra.mxu0 %v2431_v16 }
  0x13   :  { %503 = vmatpush.bf16.msra.mxu1 %v2439_v17 }
  0x14   :  { %517 = vmatpush.bf16.msra.mxu2 %v2447_v18 }
  0x15   :  { %531 = vmatpush.bf16.msra.mxu3 %v2455_v19 }
  0x16   :  { %17 = vsyncpa [#allocation3], 0  ;;  %490 = vmatpush.bf16.msra.mxu0 %v2430_v20  ;;  %v2429_v24 = vld [vmem:[%s3353_s1 + $0x8] sm:$0xff]  ;;  %v2428_v28 = vld [vmem:[%s3353_s1] sm:$0xff]  ;;  %vm481_vm0 = vcmask 1045504   ;;  %vm477_vm1 = vcmask 97280  }
  0x17   :  { %504 = vmatpush.bf16.msra.mxu1 %v2438_v21  ;;  %v2437_v25 = vld [vmem:[%s3353_s1 + $0x48] sm:$0xff]  ;;  %v2436_v29 = vld [vmem:[%s3353_s1 + $0x40] sm:$0xff]  ;;  %v2467_v31 = vld [vmem:[%s3353_s1 + $0x138] sm:$0xff]  ;;  %vm617_vm2 = vcmask 261120   ;;  %vm621_vm3 = vcmask 254976   ;;  %s2672_s29 = smov 120  }
  0x18   :  { %518 = vmatpush.bf16.msra.mxu2 %v2446_v22  ;;  %v2445_v26 = vld [vmem:[%s3353_s1 + $0x88] sm:$0xff]  ;;  %v2444_v30 = vld [vmem:[%s3353_s1 + $0x80] sm:$0xff]  ;;  %v2424_v33 = vld [vmem:[%s3352_s0 + $0x18] sm:$0x10]  ;;  %s2673_s30 = smov 80   ;;  %s2674_s13 = smov 96  }
  0x19   :  { %532 = vmatpush.bf16.msra.mxu3 %v2454_v23  ;;  %v2453_v27 = vld [vmem:[%s3353_s1 + $0xc8] sm:$0xff]  ;;  %v2058_v32 = vld [vmem:[%s3352_s0] sm:$0xf]  ;;  %v2421_v34 = vld [vmem:[%s3352_s0 + $0x4] sm:$0xf]  ;;  %s2675_s14 = smov 88  }
  0x1a   :  { %491 = vmatpush.bf16.msra.mxu0 %v2429_v24  ;;  %v2060_v35 = vld [vmem:[%s3352_s0 + $0x1c] sm:$0x10]  ;;  %v2476_v37 = vld [vmem:[%s3353_s1 + $0x180] sm:$0x30]  ;;  %v2475_v38 = vld [vmem:[%s3353_s1 + $0x178] sm:$0xff]  ;;  %v2059_v44 = vor.u32 %v2424_v33, %v2058_v32  ;;  %s2676_s15 = smov 112  }
  0x1b   :  { %505 = vmatpush.bf16.msra.mxu1 %v2437_v25  ;;  %v2278_v36 = vld [vmem:[%s3353_s1 + $0x180] sm:$0xf]  ;;  %v2066_v39 = vld [vmem:[%s3352_s0 + $0x8] sm:$0xf]  ;;  %v2425_v40 = vld [vmem:[%s3352_s0 + $0x20] sm:$0x10]  ;;  %v2063_v45 = vor.u32 %v2421_v34, %v2060_v35 }
  0x1c   :  { %519 = vmatpush.bf16.msra.mxu2 %v2445_v26  ;;  %v2452_v41 = vld [vmem:[%s3353_s1 + $0xc0] sm:$0xff]  ;;  %v2422_v42 = vld [vmem:[%s3352_s0 + $0xc] sm:$0xf]  ;;  %v2068_v43 = vld [vmem:[%s3352_s0 + $0x24] sm:$0x10]  ;;  %v2279_v46 = vor.u32 %v2476_v37, %v2278_v36  ;;  %v2067_v47 = vor.u32 %v2425_v40, %v2066_v39  ;;  %v2671_v37 = vmov 32.0  }
  0x1d   :  { %533 = vmatpush.bf16.msra.mxu3 %v2453_v27  ;;  %v2466_v48 = vld [vmem:[%s3353_s1 + $0x130] sm:$0xff]  ;;  %v2071_v49 = vor.u32 %v2422_v42, %v2068_v43  ;;  %v2465_v52 = vld [vmem:[%s3353_s1 + $0x128] sm:$0xff]  ;;  %v2464_v54 = vld [vmem:[%s3353_s1 + $0x120] sm:$0xff]  ;;  %2553 = vrcp.f32 %v2671_v37  ;;  %s2677_s16 = smov 72   ;;  %s2678_s17 = smov 104   ;;  %vm723_vm11 = vcmask 64512  }
  0x1e   :  { %492 = vmatpush.bf16.msra.mxu0 %v2428_v28  ;;  %v2474_v50 = vld [vmem:[%s3353_s1 + $0x170] sm:$0xff]  ;;  %v483_v51 = vsel %vm481_vm0, %v2279_v46, 0  ;;  %v2473_v53 = vld [vmem:[%s3353_s1 + $0x168] sm:$0xff]  ;;  %v2472_v55 = vld [vmem:[%s3353_s1 + $0x160] sm:$0xff]  ;;  %s2680_s18 = smov 64   ;;  %s2681_s19 = smov 56  }
  0x1f   :  { %506 = vmatpush.bf16.msra.mxu1 %v2436_v29  ;;  %v2463_v56 = vld [vmem:[%s3353_s1 + $0x118] sm:$0xff]  ;;  %v2427_v58 = vld [vmem:[%s3352_s0 + $0x30] sm:$0x10]  ;;  %v2461_v63 = vld [vmem:[%s3353_s1 + $0x108] sm:$0xff]  ;;  %s2682_s20 = smov 48   ;;  %s2683_s21 = smov 40  }
  0x20   :  { %520 = vmatpush.bf16.msra.mxu2 %v2444_v30  ;;  %v2082_v57 = vld [vmem:[%s3352_s0 + $0x18] sm:$0xf]  ;;  %v2462_v61 = vld [vmem:[%s3353_s1 + $0x110] sm:$0xff]  ;;  %v2469_v0 = vld [vmem:[%s3353_s1 + $0x148] sm:$0xff]  ;;  %s2684_s22 = smov 8  }
  0x21   :  { %534 = vmatpush.bf16.msra.mxu3 %v2452_v41  ;;  %493 = vmatmul.bf16.vlgmr.msra.gmra.mxu0 %v2059_v44  ;;  %v2471_v59 = vld [vmem:[%s3353_s1 + $0x158] sm:$0xff]  ;;  %v2083_v60 = vor.u32 %v2427_v58, %v2082_v57  ;;  %v2470_v62 = vld [vmem:[%s3353_s1 + $0x150] sm:$0xff]  ;;  %v2460_v1 = vld [vmem:[%s3353_s1 + $0x100] sm:$0xff] }
  0x22   :  { %541 = vmatpush.bf16.msrb.mxu0 %v2467_v31  ;;  %507 = vmatmul.bf16.vlgmr.msra.gmra.mxu1 %v2063_v45  ;;  %v2074_v2 = vld [vmem:[%s3352_s0 + $0x10] sm:$0xf]  ;;  %v2426_v3 = vld [vmem:[%s3352_s0 + $0x28] sm:$0x10]  ;;  %v2468_v4 = vld [vmem:[%s3353_s1 + $0x140] sm:$0xff]  ;;  %s2686_s1 = smov 24  }
  0x23   :  { %555 = vmatpush.bf16.msrb.mxu1 %v2475_v38  ;;  %521 = vmatmul.bf16.vlgmr.msra.gmra.mxu2 %v2067_v47  ;;  %v2423_v5 = vld [vmem:[%s3352_s0 + $0x14] sm:$0xf]  ;;  %v2076_v6 = vld [vmem:[%s3352_s0 + $0x2c] sm:$0x10]  ;;  %v2075_v7 = vor.u32 %v2426_v3, %v2074_v2  ;;  %v2554_v38 = vpop.eup %2553  ;;  %v2477_v57 = vld [vmem:[%s3355_s3] sm:$0xff]  ;;  %s2685_s0 = smov 16  }
  0x24   :  { %535 = vmatmul.bf16.vlgmr.msra.gmra.mxu3 %v2071_v49  ;;  %576 = vmatpush.bf16.msrb.mxu2 %v483_v51  ;;  %v2079_v8 = vor.u32 %v2423_v5, %v2076_v6  ;;  %v626_v39 = vmul.f32 32.0, %v2554_v38  ;;  %vm630_vm4 = vweird.f32 %v2554_v38 }
  0x26   :  { %542 = vmatpush.bf16.msrb.mxu0 %v2466_v48  ;;  %v627_v40 = vsub.f32 1.0, %v626_v39 }
  0x27   :  { %556 = vmatpush.bf16.msrb.mxu1 %v2474_v50 }
  0x28   :  { %v628_v41 = vmul.f32 %v2554_v38, %v627_v40 }
  0x2a   :  { %543 = vmatpush.bf16.msrb.mxu0 %v2465_v52  ;;  %v629_v42 = vadd.f32 %v2554_v38, %v628_v41 }
  0x2b   :  { %557 = vmatpush.bf16.msrb.mxu1 %v2473_v53 }
  0x2c   :  { %v2953_v43 = vsel %vm630_vm4, %v2554_v38, %v629_v42 }
  0x2e   :  { %544 = vmatpush.bf16.msrb.mxu0 %v2464_v54  ;;  %v2478_v54 = vld [vmem:[%s3355_s3 + $0x8] sm:$0xff] }
  0x2f   :  { %558 = vmatpush.bf16.msrb.mxu1 %v2472_v55  ;;  %706 = vmatpush.bf16.msrb.mxu3 %v2478_v54 }
  0x32   :  { %545 = vmatpush.bf16.msrb.mxu0 %v2463_v56 }
  0x33   :  { %559 = vmatpush.bf16.msrb.mxu1 %v2471_v59  ;;  %2280 = vmatmul.msk.bf16.vlgmr.msrb.gmra.mxu2 %vm477_vm1, %v2083_v60 }
  0x34   :  { %707 = vmatpush.bf16.msrb.mxu3 %v2477_v57 }
  0x36   :  { %546 = vmatpush.bf16.msrb.mxu0 %v2462_v61 }
  0x37   :  { %560 = vmatpush.bf16.msrb.mxu1 %v2470_v62 }
  0x3a   :  { %547 = vmatpush.bf16.msrb.mxu0 %v2461_v63 }
  0x3b   :  { %561 = vmatpush.bf16.msrb.mxu1 %v2469_v0 }
  0x3e   :  { %548 = vmatpush.bf16.msrb.mxu0 %v2460_v1 }
  0x3f   :  { %562 = vmatpush.bf16.msrb.mxu1 %v2468_v4 }
  0x41   :  { %549 = vmatmul.bf16.vlgmr.msrb.gmra.mxu0 %v2075_v7 }
  0x42   :  { %563 = vmatmul.bf16.vlgmr.msrb.gmra.mxu1 %v2079_v8 }
  0x9e   :  { %v494_v9 = vpop.f32.mrf.mxu0 }
  0x9f   :  { %v508_v10 = vpop.f32.mrf.mxu1 }
  0xa0   :  { %v509_v12 = vadd.f32 %v508_v10, %v494_v9  ;;  %v2972_v9 = vld [vmem:[%s3354_s2] sm:$0x3f] }
  0xa6   :  { %v522_v11 = vpop.f32.mrf.mxu2  ;;  %v496_v13 = vpop.f32.mrf.mxu0 }
  0xa7   :  { %v510_v14 = vpop.f32.mrf.mxu1  ;;  %v536_v15 = vpop.f32.mrf.mxu3  ;;  %v523_v17 = vadd.f32 %v522_v11, %v509_v12  ;;  %v670_v12 = vperm.slane %v2972_v9, 0 }
  0xa8   :  { %v511_v19 = vadd.f32 %v510_v14, %v496_v13 }
  0xa9   :  { %v537_v18 = vadd.f32 %v536_v15, %v523_v17  ;;  %v673_v17 = vperm.slane %v2972_v9, 1 }
  0xae   :  { %v524_v16 = vpop.f32.mrf.mxu2 }
  0xaf   :  { %v525_v24 = vadd.f32 %v524_v16, %v511_v19  ;;  %v538_v26 = vpop.f32.mrf.mxu3 }
  0xb1   :  { %v539_v28 = vadd.f32 %v538_v26, %v525_v24 }
  0xb6   :  { %v578_v23 = vpop.f32.mrf.mxu2 }
  0xbe   :  { %v550_v20 = vpop.f32.mrf.mxu0  ;;  %v580_v34 = vpop.f32.mrf.mxu2 }
  0xbf   :  { %v551_v21 = vadd.f32 %v550_v20, %v537_v18  ;;  %v564_v22 = vpop.f32.mrf.mxu1 }
  0xc1   :  { %v565_v25 = vadd.f32 %v564_v22, %v551_v21 }
  0xc3   :  { %v2945_v27 = vadd.f32 %v578_v23, %v565_v25  ;;  %v2546_v23 = vld [vmem:[%s3356_s4] ss:$0 sm:$0xff] }
  0xc5   :  { %v618_v29 = vsel %vm617_vm2, %v2945_v27, 0.0 }
  0xc6   :  { %v552_v30 = vpop.f32.mrf.mxu0  ;;  %619 = vadd.xlane.f32.xlu0 %v618_v29 }
  0xc7   :  { %v553_v31 = vadd.f32 %v552_v30, %v539_v28  ;;  %v566_v32 = vpop.f32.mrf.mxu1 }
  0xc9   :  { %v567_v33 = vadd.f32 %v566_v32, %v553_v31 }
  0xcb   :  { %v2949_v35 = vadd.f32 %v580_v34, %v567_v33 }
  0xcd   :  { %v622_v36 = vsel %vm621_vm3, %v2949_v35, 0.0 }
  0xce   :  { %623 = vadd.xlane.f32.xlu0 %v622_v36 }
 0x139   :  { %v620_v44 = vpop.xlane.xlu0 %619 }
 0x13a   :  { %v632_v45 = vmul.f32 %v2953_v43, %v620_v44 }
 0x13c   :  { %v634_v46 = vsub.f32 %v2945_v27, %v632_v45 }
 0x13e   :  { %v636_v47 = vmul.f32 %v634_v46, %v634_v46 }
 0x140   :  { %v638_v48 = vsel %vm617_vm2, %v636_v47, 0.0 }
 0x141   :  { %639 = vadd.xlane.f32.xlu1 %v638_v48  ;;  %v624_v49 = vpop.xlane.xlu0 %623 }
 0x142   :  { %v633_v50 = vmul.f32 %v2953_v43, %v624_v49 }
 0x144   :  { %v635_v51 = vsub.f32 %v2949_v35, %v633_v50  ;;  %v2679_v50 = vmov -1e+30  }
 0x146   :  { %v637_v52 = vmul.f32 %v635_v51, %v635_v51 }
 0x148   :  { %v641_v53 = vsel %vm621_vm3, %v637_v52, 0.0 }
 0x149   :  { %642 = vadd.xlane.f32.xlu1 %v641_v53 }
 0x1b4   :  { %v640_v55 = vpop.xlane.xlu1 %639 }
 0x1b5   :  { %v644_v56 = vmul.f32 %v640_v55, %v2953_v43 }
 0x1b7   :  { %v646_v58 = vadd.f32 1e-06, %v644_v56 }
 0x1b9   :  { %2555 = vrsqrt.f32 %v646_v58  ;;  %vm654_vm6 = vweird.f32 %v646_v58 }
 0x1bc   :  { %v643_v59 = vpop.xlane.xlu1 %642 }
 0x1bd   :  { %v645_v60 = vmul.f32 %v643_v59, %v2953_v43 }
 0x1bf   :  { %v2556_v61 = vpop.eup %2555  ;;  %v647_v62 = vadd.f32 1e-06, %v645_v60 }
 0x1c0   :  { %v649_v63 = vmul.f32 %v2556_v61, %v646_v58  ;;  %vm655_vm5 = vweird.f32 %v2556_v61 }
 0x1c1   :  { %2557 = vrsqrt.f32 %v647_v62  ;;  %vm656_vm7 = vmor %vm654_vm6, %vm655_vm5  ;;  %vm664_vm9 = vweird.f32 %v647_v62 }
 0x1c2   :  { %v650_v0 = vmul.f32 %v2556_v61, %v649_v63 }
 0x1c4   :  { %v651_v1 = vmul.f32 0.5, %v650_v0 }
 0x1c6   :  { %v652_v2 = vsub.f32 1.5, %v651_v1 }
 0x1c7   :  { %v2558_v3 = vpop.eup %2557 }
 0x1c8   :  { %v653_v4 = vmul.f32 %v2556_v61, %v652_v2  ;;  %v659_v5 = vmul.f32 %v2558_v3, %v647_v62  ;;  %vm665_vm8 = vweird.f32 %v2558_v3 }
 0x1c9   :  { %vm666_vm10 = vmor %vm664_vm9, %vm665_vm8  ;;  %vm744_vm8 = vcmask 80896  }
 0x1ca   :  { %v660_v6 = vmul.f32 %v2558_v3, %v659_v5  ;;  %v657_v7 = vsel %vm656_vm7, %v2556_v61, %v653_v4 }
 0x1cb   :  { %v668_v11 = vmul.f32 %v657_v7, %v634_v46  ;;  %v583_v46 = vlaneseq }
 0x1cc   :  { %v661_v8 = vmul.f32 0.5, %v660_v6 }
 0x1cd   :  { %v671_v16 = vmul.f32 %v670_v12, %v668_v11  ;;  %v584_v47 = vshrl.u32 %v583_v46, 7  ;;  %v587_v48 = vand.u32 127, %v583_v46 }
 0x1ce   :  { %v662_v10 = vsub.f32 1.5, %v661_v8 }
 0x1cf   :  { %v674_v19 = vadd.f32 %v673_v17, %v671_v16  ;;  %vm600_vm12 = vcmp.ge.s32.totalorder %v584_v47, 5  ;;  %vm606_vm13 = vcmp.ge.s32.totalorder %v587_v48, 5  ;;  %vm590_vm14 = vcmp.lt.s32.totalorder %v584_v47, 5 }
 0x1d0   :  { %v663_v13 = vmul.f32 %v2558_v3, %v662_v10  ;;  %vm597_vm15 = vcmp.lt.s32.totalorder %v587_v48, 5  ;;  %vm607_vm0 = vmand %vm600_vm12, %vm606_vm13  ;;  %vm609_vm1 = vcmp.lt.s32.totalorder %v587_v48, 10  ;;  %v585_v49 = vadd.s32 8, %v584_v47 }
 0x1d1   :  { %vm598_vm4 = vmand %vm590_vm14, %vm597_vm15  ;;  %vm748_vm12 = vcmask 74752   ;;  %vm1025_vm14 = vcmask 130048   ;;  %vm1028_vm15 = vcmask 195584  }
 0x1d2   :  { %v667_v14 = vsel %vm666_vm10, %v2558_v3, %v663_v13  ;;  %vm610_vm5 = vmand %vm607_vm0, %vm609_vm1  ;;  %vm603_vm7 = vcmp.lt.s32.totalorder %v585_v49, 10 }
 0x1d3   :  { %v669_v15 = vmul.f32 %v667_v14, %v635_v51  ;;  %vm612_vm6 = vmor %vm598_vm4, %vm610_vm5 }
 0x1d4   :  { %v3005_v51 = vsel %vm612_vm6, 0.0, %v2679_v50  ;;  %vm608_vm9 = vmand %vm603_vm7, %vm606_vm13  ;;  %vm774_vm13 = vcmask 1044480  }
 0x1d5   :  { %v672_v18 = vmul.f32 %v670_v12, %v669_v15  ;;  %vm611_vm10 = vmand %vm608_vm9, %vm609_vm1 }
 0x1d6   :  { %v3009_v55 = vsel %vm611_vm10, 0.0, %v2679_v50 }
 0x1d7   :  { %v675_v20 = vadd.f32 %v673_v17, %v672_v18 }
 0x1d9   :  { %v676_v21 = vpack.c.bf16 %v675_v20, %v674_v19 }
 0x1db   :  { %2289 = vmatmul.msk.bf16.vlgmr.msrb.gmra.mxu3 %vm617_vm2, %v676_v21 }
 0x25e   :  { %v709_v22 = vpop.f32.mrf.mxu3 }
 0x25f   :  { %v710_v24 = vadd.f32 %v2546_v23, %v709_v22 }
 0x261   :  { %v714_v26 = vpack.c.bf16 %v710_v24, %v710_v24 }
 0x263   :  { %v718_v30 = vunpack.c.l.b16 %v714_v26 }
 0x266   :  { %v711_v25 = vpop.f32.mrf.mxu3 }
 0x267   :  { %v712_v28 = vadd.f32 %v2546_v23, %v711_v25 }
 0x269   :  { %v715_v29 = vpack.c.bf16 %v712_v28, %v712_v28 }
 0x26b   :  { %v719_v31 = vunpack.c.l.b16 %v715_v29 }
 0x26d   :  { %v2980_v32 = vpack.c.b16 %v719_v31, %v718_v30 }
 0x26f   :  { %792 = vrot.lane.b32.xlu1 %v2980_v32, %s2672_s29  ;;  %863 = vrot.lane.b32.xlu0 %v2980_v32, %s2673_s30 }
 0x270   :  { %721 = vrot.lane.b32.xlu2 %v2980_v32, %s2674_s13 }
 0x278   :  { %794 = vrot.lane.b32.xlu2 %v2980_v32, %s2675_s14 }
 0x280   :  { %861 = vrot.lane.b32.xlu2 %v2980_v32, %s2676_s15 }
 0x288   :  { %932 = vrot.lane.b32.xlu2 %v2980_v32, %s2677_s16 }
 0x290   :  { %930 = vrot.lane.b32.xlu2 %v2980_v32, %s2678_s17 }
 0x2ca   :  { %v722_v33 = vpop.permute.xlu2 %721 }
 0x2cb   :  { %v728_v34 = vsel %vm723_vm11, %v722_v33, 0 }
 0x2cc   :  { %737 = vmatpush.bf16.xpose.msra.mxu2 %v728_v34 }
 0x2d2   :  { %v795_v36 = vpop.permute.xlu2 %794 }
 0x2d3   :  { %v800_v37 = vsel %vm723_vm11, %v795_v36, 0  ;;  %2290 = vmatmul.msk.bf16.vlgmr.msra.gmra.mxu2 %vm723_vm11, %v2980_v32 }
 0x2d4   :  { %809 = vmatpush.bf16.xpose.msra.mxu0 %v800_v37 }
 0x2da   :  { %v862_v38 = vpop.permute.xlu2 %861 }
 0x2e1   :  { %v793_v39 = vpop.permute.xlu1 %792  ;;  %v864_v40 = vpop.permute.xlu0 %863 }
 0x2e2   :  { %v869_v41 = vsel %vm723_vm11, %v864_v40, 0  ;;  %v933_v42 = vpop.permute.xlu2 %932  ;;  %2292 = vmatmul.msk.bf16.vlgmr.msra.gmra.mxu0 %vm723_vm11, %v793_v39 }
 0x2e3   :  { %v938_v44 = vsel %vm723_vm11, %v933_v42, 0  ;;  %878 = vmatpush.bf16.xpose.msrb.mxu2 %v869_v41 }
 0x2e4   :  { %947 = vmatpush.bf16.xpose.msrb.mxu0 %v938_v44 }
 0x2ea   :  { %2294 = vmatmul.msk.bf16.vlgmr.msrb.gmra.mxu2 %vm723_vm11, %v862_v38  ;;  %v931_v45 = vpop.permute.xlu2 %930 }
 0x2f2   :  { %2296 = vmatmul.msk.bf16.vlgmr.msrb.gmra.mxu0 %vm723_vm11, %v931_v45 }
 0x356   :  { %v739_v52 = vpop.f32.mrf.mxu2 }
 0x357   :  { %v740_v53 = vadd.f32 %v739_v52, %v3005_v51 }
 0x359   :  { %v745_v54 = vsel %vm744_vm8, %v740_v53, -inf }
 0x35a   :  { %746 = vmax.xlane.f32.xlu0 %v745_v54 }
 0x35e   :  { %v741_v56 = vpop.f32.mrf.mxu2 }
 0x35f   :  { %v742_v57 = vadd.f32 %v741_v56, %v3009_v55  ;;  %v811_v58 = vpop.f32.mrf.mxu0 }
 0x360   :  { %v812_v59 = vadd.f32 %v811_v58, %v3005_v51 }
 0x361   :  { %v749_v60 = vsel %vm748_vm12, %v742_v57, -inf }
 0x362   :  { %750 = vmax.xlane.f32.xlu2 %v749_v60  ;;  %v816_v61 = vsel %vm744_vm8, %v812_v59, -inf }
 0x363   :  { %817 = vmax.xlane.f32.xlu1 %v816_v61 }
 0x367   :  { %v813_v62 = vpop.f32.mrf.mxu0 }
 0x368   :  { %v814_v63 = vadd.f32 %v813_v62, %v3009_v55 }
 0x36a   :  { %v819_v0 = vsel %vm748_vm12, %v814_v63, -inf }
 0x36b   :  { %820 = vmax.xlane.f32.xlu0 %v819_v0 }
 0x36d   :  { %v880_v1 = vpop.f32.mrf.mxu2 }
 0x36e   :  { %v881_v2 = vadd.f32 %v880_v1, %v3005_v51 }
 0x36f   :  { %v949_v3 = vpop.f32.mrf.mxu0 }
 0x370   :  { %v3019_v4 = vadd.f32 %v949_v3, %v3005_v51  ;;  %v885_v5 = vsel %vm744_vm8, %v881_v2, -inf }
 0x371   :  { %886 = vmax.xlane.f32.xlu2 %v885_v5 }
 0x372   :  { %v954_v6 = vsel %vm744_vm8, %v3019_v4, -inf }
 0x373   :  { %955 = vmax.xlane.f32.xlu0 %v954_v6 }
 0x375   :  { %v882_v7 = vpop.f32.mrf.mxu2 }
 0x376   :  { %v883_v8 = vadd.f32 %v882_v7, %v3009_v55 }
 0x377   :  { %v951_v10 = vpop.f32.mrf.mxu0 }
 0x378   :  { %v952_v11 = vadd.f32 %v951_v10, %v3009_v55  ;;  %v888_v12 = vsel %vm748_vm12, %v883_v8, -inf }
 0x379   :  { %889 = vmax.xlane.f32.xlu1 %v888_v12 }
 0x37a   :  { %v957_v13 = vsel %vm748_vm12, %v952_v11, -inf }
 0x37b   :  { %958 = vmax.xlane.f32.xlu2 %v957_v13 }
 0x3cd   :  { %v747_v14 = vpop.xlane.xlu0 %746 }
 0x3ce   :  { %v752_v15 = vsub.f32 %v740_v53, %v747_v14 }
 0x3d0   :  { %v754_v16 = vmul.f32 1.442695, %v752_v15 }
 0x3d2   :  { %2559 = vpow2.f32 %v754_v16 }
 0x3d5   :  { %v751_v17 = vpop.xlane.xlu2 %750 }
 0x3d6   :  { %v753_v18 = vsub.f32 %v742_v57, %v751_v17  ;;  %v818_v19 = vpop.xlane.xlu1 %817 }
 0x3d7   :  { %v822_v20 = vsub.f32 %v812_v59, %v818_v19 }
 0x3d8   :  { %v3028_v21 = vpop.eup %2559  ;;  %v756_v22 = vmul.f32 1.442695, %v753_v18 }
 0x3d9   :  { %v824_v23 = vmul.f32 1.442695, %v822_v20  ;;  %v758_v24 = vsel %vm744_vm8, %v3028_v21, 0.0 }
 0x3da   :  { %2561 = vpow2.f32 %v756_v22  ;;  %759 = vadd.xlane.f32.xlu1 %v758_v24 }
 0x3db   :  { %2563 = vpow2.f32 %v824_v23 }
 0x3de   :  { %v821_v25 = vpop.xlane.xlu0 %820 }
 0x3df   :  { %v823_v26 = vsub.f32 %v814_v63, %v821_v25 }
 0x3e0   :  { %v3032_v28 = vpop.eup %2561 }
 0x3e1   :  { %v2564_v29 = vpop.eup %2563  ;;  %v826_v30 = vmul.f32 1.442695, %v823_v26  ;;  %v761_v31 = vsel %vm748_vm12, %v3032_v28, 0.0 }
 0x3e2   :  { %762 = vadd.xlane.f32.xlu0 %v761_v31  ;;  %v828_v33 = vsel %vm744_vm8, %v2564_v29, 0.0 }
 0x3e3   :  { %2565 = vpow2.f32 %v826_v30  ;;  %829 = vadd.xlane.f32.xlu2 %v828_v33 }
 0x3e4   :  { %v887_v34 = vpop.xlane.xlu2 %886 }
 0x3e5   :  { %v891_v36 = vsub.f32 %v881_v2, %v887_v34 }
 0x3e6   :  { %v956_v54 = vpop.xlane.xlu0 %955 }
 0x3e7   :  { %v893_v37 = vmul.f32 1.442695, %v891_v36  ;;  %v960_v56 = vsub.f32 %v3019_v4, %v956_v54 }
 0x3e9   :  { %v2566_v38 = vpop.eup %2565  ;;  %2567 = vpow2.f32 %v893_v37  ;;  %v962_v57 = vmul.f32 1.442695, %v960_v56 }
 0x3ea   :  { %v831_v39 = vsel %vm748_vm12, %v2566_v38, 0.0 }
 0x3eb   :  { %832 = vadd.xlane.f32.xlu1 %v831_v39 }
 0x3ec   :  { %v890_v40 = vpop.xlane.xlu1 %889 }
 0x3ed   :  { %v892_v45 = vsub.f32 %v883_v8, %v890_v40 }
 0x3ee   :  { %v959_v41 = vpop.xlane.xlu2 %958 }
 0x3ef   :  { %v3038_v42 = vpop.eup %2567  ;;  %v961_v44 = vsub.f32 %v952_v11, %v959_v41  ;;  %v895_v48 = vmul.f32 1.442695, %v892_v45 }
 0x3f0   :  { %v897_v47 = vsel %vm744_vm8, %v3038_v42, 0.0 }
 0x3f1   :  { %v964_v46 = vmul.f32 1.442695, %v961_v44 }
 0x3f3   :  { %2569 = vpow2.f32 %v964_v46  ;;  %898 = vadd.xlane.f32.xlu1 %v897_v47  ;;  %v2480_v47 = vld [vmem:[%s3357_s5 + $0x8] sm:$0xff] }
 0x3f4   :  { %2571 = vpow2.f32 %v895_v48  ;;  %1058 = vmatpush.bf16.msra.mxu2 %v2480_v47  ;;  %v2479_v48 = vld [vmem:[%s3357_s5] sm:$0xff] }
 0x3f5   :  { %2573 = vpow2.f32 %v962_v57 }
 0x3f6   :  { %769 = vrot.lane.b32.xlu0 %v2980_v32, %s2680_s18 }
 0x3f8   :  { %1059 = vmatpush.bf16.msra.mxu2 %v2479_v48  ;;  %v1115_v48 = vperm.slane %v2972_v9, 3 }
 0x3f9   :  { %v3044_v49 = vpop.eup %2569 }
 0x3fa   :  { %v969_v50 = vsel %vm748_vm12, %v3044_v49, 0.0  ;;  %v2572_v52 = vpop.eup %2571 }
 0x3fb   :  { %839 = vrot.lane.b32.xlu2 %v2980_v32, %s2681_s19  ;;  %970 = vadd.xlane.f32.xlu1 %v969_v50  ;;  %v900_v53 = vsel %vm748_vm12, %v2572_v52, 0.0  ;;  %v2574_v58 = vpop.eup %2573 }
 0x3fc   :  { %v966_v59 = vsel %vm744_vm8, %v2574_v58, 0.0 }
 0x403   :  { %908 = vrot.lane.b32.xlu2 %v2980_v32, %s2682_s20  ;;  %901 = vadd.xlane.f32.xlu1 %v900_v53 }
 0x41c   :  { %977 = vrot.lane.b32.xlu1 %v2980_v32, %s2683_s21 }
 0x420   :  { %967 = vadd.xlane.f32.xlu0 %v966_v59 }
 0x44d   :  { %v760_v60 = vpop.xlane.xlu1 %759 }
 0x455   :  { %v763_v62 = vpop.xlane.xlu0 %762 }
 0x456   :  { %v830_v61 = vpop.xlane.xlu2 %829 }
 0x457   :  { %2575 = vrcp.f32 %v830_v61 }
 0x458   :  { %2577 = vrcp.f32 %v763_v62 }
 0x45d   :  { %v2576_v2 = vpop.eup %2575 }
 0x45e   :  { %v833_v63 = vpop.xlane.xlu1 %832  ;;  %v840_v0 = vpop.permute.xlu2 %839  ;;  %v836_v5 = vmul.f32 %v2576_v2, %v2564_v29 }
 0x45f   :  { %2579 = vrcp.f32 %v833_v63  ;;  %v845_v1 = vsel %vm774_vm13, %v840_v0, 0  ;;  %v2578_v3 = vpop.eup %2577 }
 0x460   :  { %2581 = vrcp.f32 %v760_v60  ;;  %854 = vmatpush.bf16.msra.mxu1 %v845_v1  ;;  %v767_v8 = vmul.f32 %v2578_v3, %v3032_v28  ;;  %v1036_v3 = vperm.slane %v2972_v9, 4 }
 0x465   :  { %v2580_v4 = vpop.eup %2579 }
 0x466   :  { %v2582_v32 = vpop.eup %2581  ;;  %v837_v6 = vmul.f32 %v2580_v4, %v2566_v38  ;;  %v899_v7 = vpop.xlane.xlu1 %898 }
 0x467   :  { %v909_v10 = vpop.permute.xlu2 %908  ;;  %v766_v13 = vmul.f32 %v2582_v32, %v3028_v21  ;;  %2583 = vrcp.f32 %v899_v7 }
 0x468   :  { %v838_v11 = vpack.c.bf16 %v837_v6, %v836_v5  ;;  %v770_v12 = vpop.permute.xlu0 %769  ;;  %v914_v15 = vsel %vm774_vm13, %v909_v10, 0 }
 0x469   :  { %v776_v14 = vsel %vm774_vm13, %v770_v12, 0  ;;  %v768_v16 = vpack.c.bf16 %v767_v8, %v766_v13 }
 0x46a   :  { %785 = vmatpush.bf16.msra.mxu3 %v776_v14  ;;  %2293 = vmatmul.msk.bf16.vlgmr.msra.gmra.mxu1 %vm744_vm8, %v838_v11 }
 0x46d   :  { %2291 = vmatmul.msk.bf16.vlgmr.msra.gmra.mxu3 %vm744_vm8, %v768_v16  ;;  %v2584_v19 = vpop.eup %2583 }
 0x46e   :  { %923 = vmatpush.bf16.msrb.mxu3 %v914_v15  ;;  %v971_v17 = vpop.xlane.xlu1 %970  ;;  %v905_v22 = vmul.f32 %v2584_v19, %v3038_v42 }
 0x476   :  { %v902_v18 = vpop.xlane.xlu1 %901 }
 0x477   :  { %2585 = vrcp.f32 %v902_v18 }
 0x478   :  { %2587 = vrcp.f32 %v971_v17 }
 0x47d   :  { %v2586_v20 = vpop.eup %2585 }
 0x47e   :  { %v906_v21 = vmul.f32 %v2586_v20, %v2572_v52  ;;  %v2588_v28 = vpop.eup %2587  ;;  %v2482_v20 = vld [vmem:[%s3358_s6 + $0x8] sm:$0xff] }
 0x47f   :  { %v975_v30 = vmul.f32 %v2588_v28, %v3044_v49  ;;  %1148 = vmatpush.bf16.msra.mxu3 %v2482_v20  ;;  %v2485_v20 = vld [vmem:[%s3360_s8 + $0x10] sm:$0xff] }
 0x480   :  { %v907_v23 = vpack.c.bf16 %v906_v21, %v905_v22 }
 0x482   :  { %2295 = vmatmul.msk.bf16.vlgmr.msrb.gmra.mxu3 %vm744_vm8, %v907_v23  ;;  %v2481_v23 = vld [vmem:[%s3358_s6] sm:$0xff] }
 0x483   :  { %1149 = vmatpush.bf16.msra.mxu3 %v2481_v23 }
 0x48e   :  { %v978_v24 = vpop.permute.xlu1 %977 }
 0x48f   :  { %v983_v25 = vsel %vm774_vm13, %v978_v24, 0 }
 0x490   :  { %992 = vmatpush.bf16.msrb.mxu1 %v983_v25 }
 0x493   :  { %v968_v26 = vpop.xlane.xlu0 %967 }
 0x494   :  { %2589 = vrcp.f32 %v968_v26 }
 0x49a   :  { %v2590_v29 = vpop.eup %2589 }
 0x49b   :  { %v974_v31 = vmul.f32 %v2590_v29, %v2574_v58 }
 0x49d   :  { %v976_v33 = vpack.c.bf16 %v975_v30, %v974_v31 }
 0x49f   :  { %2297 = vmatmul.msk.bf16.vlgmr.msrb.gmra.mxu1 %vm744_vm8, %v976_v33 }
 0x4e7   :  { %v856_v34 = vpop.f32.mrf.mxu1 }
 0x4ef   :  { %v858_v36 = vpop.f32.mrf.mxu1 }
 0x4f0   :  { %v2516_v37 = vpack.i.bf16 %v858_v36, %v856_v34  ;;  %v787_v38 = vpop.f32.mrf.mxu3 }
 0x4f2   :  { %2517 = vrot.lane.b32.xlu2 %v2516_v37, %s2684_s22 }
 0x4f8   :  { %v789_v39 = vpop.f32.mrf.mxu3 }
 0x505   :  { %v925_v40 = vpop.f32.mrf.mxu3 }
 0x50d   :  { %v927_v41 = vpop.f32.mrf.mxu3 }
 0x50e   :  { %v2521_v42 = vpack.i.bf16 %v927_v41, %v925_v40 }
 0x510   :  { %2522 = vrot.lane.b32.xlu2 %v2521_v42, %s2685_s0 }
 0x51c   :  { %v994_v44 = vpop.f32.mrf.mxu1 }
 0x524   :  { %v996_v45 = vpop.f32.mrf.mxu1 }
 0x525   :  { %v2526_v46 = vpack.i.bf16 %v996_v45, %v994_v44  ;;  %v1112_v44 = vperm.slane %v2972_v9, 2 }
 0x527   :  { %2527 = vrot.lane.b32.xlu2 %v2526_v46, %s2686_s1 }
 0x54c   :  { %v2518_v49 = vpop.permute.xlu2 %2517 }
 0x54d   :  { %v2520_v52 = vunpack.i.h.bf16 %v2518_v49  ;;  %v2519_v53 = vunpack.i.l.bf16 %v2518_v49 }
 0x54f   :  { %v1024_v58 = vsel %vm723_vm11, %v789_v39, %v2520_v52  ;;  %v1023_v59 = vsel %vm723_vm11, %v787_v38, %v2519_v53 }
 0x56a   :  { %v2523_v50 = vpop.permute.xlu2 %2522 }
 0x56b   :  { %v2525_v54 = vunpack.i.h.bf16 %v2523_v50  ;;  %v2524_v56 = vunpack.i.l.bf16 %v2523_v50 }
 0x56d   :  { %v1026_v62 = vsel %vm1025_vm14, %v1023_v59, %v2524_v56  ;;  %v1027_v63 = vsel %vm1025_vm14, %v1024_v58, %v2525_v54 }
 0x581   :  { %v2528_v57 = vpop.permute.xlu2 %2527 }
 0x582   :  { %v2530_v60 = vunpack.i.h.bf16 %v2528_v57  ;;  %v2529_v61 = vunpack.i.l.bf16 %v2528_v57  ;;  %v2547_v57 = vld [vmem:[%s3359_s7] ss:$0 sm:$0xff] }
 0x584   :  { %v1029_v0 = vsel %vm1028_vm15, %v1026_v62, %v2529_v61  ;;  %v1030_v1 = vsel %vm1028_vm15, %v1027_v63, %v2530_v60 }
 0x585   :  { %v1031_v2 = vpack.c.bf16 %v1030_v1, %v1029_v0 }
 0x587   :  { %2306 = vmatmul.msk.bf16.vlgmr.msra.gmra.mxu2 %vm617_vm2, %v1031_v2 }
 0x60a   :  { %v1061_v4 = vpop.f32.mrf.mxu2 }
 0x60b   :  { %v1062_v32 = vadd.f32 %v1061_v4, %v1036_v3 }
 0x60d   :  { %v3087_v5 = vadd.f32 %v1062_v32, %v2945_v27 }
 0x60f   :  { %v1068_v6 = vsel %vm617_vm2, %v3087_v5, 0.0 }
 0x610   :  { %1069 = vadd.xlane.f32.xlu1 %v1068_v6 }
 0x612   :  { %v1063_v7 = vpop.f32.mrf.mxu2 }
 0x613   :  { %v1064_v8 = vadd.f32 %v1063_v7, %v1036_v3 }
 0x615   :  { %v3092_v10 = vadd.f32 %v1064_v8, %v2949_v35 }
 0x617   :  { %v1071_v11 = vsel %vm621_vm3, %v3092_v10, 0.0 }
 0x618   :  { %1072 = vadd.xlane.f32.xlu2 %v1071_v11 }
 0x683   :  { %v1070_v12 = vpop.xlane.xlu1 %1069 }
 0x684   :  { %v1074_v13 = vmul.f32 %v1070_v12, %v2953_v43 }
 0x686   :  { %v1076_v14 = vsub.f32 %v3087_v5, %v1074_v13 }
 0x688   :  { %v1078_v27 = vmul.f32 %v1076_v14, %v1076_v14 }
 0x68a   :  { %v1080_v15 = vsel %vm617_vm2, %v1078_v27, 0.0 }
 0x68b   :  { %v1073_v16 = vpop.xlane.xlu2 %1072  ;;  %1081 = vadd.xlane.f32.xlu0 %v1080_v15 }
 0x68c   :  { %v1075_v17 = vmul.f32 %v1073_v16, %v2953_v43 }
 0x68e   :  { %v1077_v18 = vsub.f32 %v3092_v10, %v1075_v17 }
 0x690   :  { %v1079_v35 = vmul.f32 %v1077_v18, %v1077_v18 }
 0x692   :  { %v1083_v19 = vsel %vm621_vm3, %v1079_v35, 0.0 }
 0x693   :  { %1084 = vadd.xlane.f32.xlu0 %v1083_v19 }
 0x6fe   :  { %v1082_v22 = vpop.xlane.xlu0 %1081 }
 0x6ff   :  { %v1086_v21 = vmul.f32 %v1082_v22, %v2953_v43 }
 0x701   :  { %v1088_v24 = vadd.f32 1e-06, %v1086_v21 }
 0x703   :  { %2591 = vrsqrt.f32 %v1088_v24  ;;  %vm1096_vm1 = vweird.f32 %v1088_v24 }
 0x706   :  { %v1085_v25 = vpop.xlane.xlu0 %1084 }
 0x707   :  { %v1087_v26 = vmul.f32 %v1085_v25, %v2953_v43 }
 0x709   :  { %v2592_v28 = vpop.eup %2591  ;;  %v1089_v29 = vadd.f32 1e-06, %v1087_v26 }
 0x70a   :  { %v1091_v30 = vmul.f32 %v2592_v28, %v1088_v24  ;;  %vm1097_vm0 = vweird.f32 %v2592_v28 }
 0x70b   :  { %2593 = vrsqrt.f32 %v1089_v29  ;;  %vm1098_vm4 = vmor %vm1096_vm1, %vm1097_vm0  ;;  %vm1106_vm6 = vweird.f32 %v1089_v29 }
 0x70c   :  { %v1092_v31 = vmul.f32 %v2592_v28, %v1091_v30 }
 0x70e   :  { %v1093_v33 = vmul.f32 0.5, %v1092_v31 }
 0x710   :  { %v1094_v34 = vsub.f32 1.5, %v1093_v33 }
 0x711   :  { %v2594_v36 = vpop.eup %2593 }
 0x712   :  { %v1095_v37 = vmul.f32 %v2592_v28, %v1094_v34  ;;  %v1101_v38 = vmul.f32 %v2594_v36, %v1089_v29  ;;  %vm1107_vm5 = vweird.f32 %v2594_v36  ;;  %v2484_v29 = vld [vmem:[%s3360_s8 + $0x8] sm:$0xff] }
 0x713   :  { %vm1108_vm7 = vmor %vm1106_vm6, %vm1107_vm5 }
 0x714   :  { %v1102_v39 = vmul.f32 %v2594_v36, %v1101_v38  ;;  %v1099_v40 = vsel %vm1098_vm4, %v2592_v28, %v1095_v37  ;;  %v2483_v37 = vld [vmem:[%s3360_s8] sm:$0xff] }
 0x715   :  { %v1110_v45 = vmul.f32 %v1099_v40, %v1076_v14  ;;  %v2486_v14 = vld [vmem:[%s3360_s8 + $0x18] sm:$0xff] }
 0x716   :  { %v1103_v41 = vmul.f32 0.5, %v1102_v39  ;;  %1286 = vmatpush.bf16.msra.mxu0 %v2486_v14 }
 0x717   :  { %v1113_v49 = vmul.f32 %v1112_v44, %v1110_v45 }
 0x718   :  { %v1104_v42 = vsub.f32 1.5, %v1103_v41 }
 0x719   :  { %v1116_v53 = vadd.f32 %v1115_v48, %v1113_v49 }
 0x71a   :  { %v1105_v46 = vmul.f32 %v2594_v36, %v1104_v42  ;;  %1287 = vmatpush.bf16.msra.mxu0 %v2485_v20 }
 0x71c   :  { %v1109_v47 = vsel %vm1108_vm7, %v2594_v36, %v1105_v46 }
 0x71d   :  { %v1111_v50 = vmul.f32 %v1109_v47, %v1077_v18 }
 0x71e   :  { %1288 = vmatpush.bf16.msra.mxu0 %v2484_v29 }
 0x71f   :  { %v1114_v52 = vmul.f32 %v1112_v44, %v1111_v50 }
 0x721   :  { %v1117_v54 = vadd.f32 %v1115_v48, %v1114_v52 }
 0x722   :  { %1289 = vmatpush.bf16.msra.mxu0 %v2483_v37 }
 0x723   :  { %v1118_v56 = vpack.c.bf16 %v1117_v54, %v1116_v53 }
 0x725   :  { %2315 = vmatmul.msk.bf16.vlgmr.msra.gmra.mxu3 %vm617_vm2, %v1118_v56 }
 0x7a8   :  { %v1151_v58 = vpop.f32.mrf.mxu3 }
 0x7a9   :  { %v3116_v59 = vadd.f32 %v2547_v57, %v1151_v58 }
 0x7ab   :  { %v3119_v60 = vmul.f32 0.70710677, %v3116_v59  ;;  %v1156_v20 = vmul.f32 0.5, %v3116_v59 }
 0x7ad   :  { %v1160_v61 = vmul.f32 %v3119_v60, %v3119_v60 }
 0x7af   :  { %v1161_v62 = vmin.f32 %v1160_v61, 16.0 }
 0x7b0   :  { %v1153_v63 = vpop.f32.mrf.mxu3 }
 0x7b1   :  { %v1162_v0 = vmul.f32 2.1237322e-06, %v1161_v62  ;;  %v1173_v1 = vmul.f32 3.8918573e-05, %v1161_v62  ;;  %v3123_v2 = vadd.f32 %v2547_v57, %v1153_v63 }
 0x7b3   :  { %v1163_v3 = vadd.f32 0.00028619796, %v1162_v0  ;;  %v1174_v4 = vadd.f32 0.001143296, %v1173_v1  ;;  %v3126_v32 = vmul.f32 0.70710677, %v3123_v2 }
 0x7b5   :  { %v1175_v6 = vmul.f32 %v1174_v4, %v1161_v62  ;;  %v1200_v7 = vmul.f32 %v3126_v32, %v3126_v32  ;;  %v1164_v8 = vmul.f32 %v1163_v3, %v1161_v62 }
 0x7b7   :  { %v1176_v11 = vadd.f32 0.014752088, %v1175_v6  ;;  %v1201_v12 = vmin.f32 %v1200_v7, 16.0  ;;  %v1165_v16 = vadd.f32 0.0036580483, %v1164_v8 }
 0x7b9   :  { %v1177_v13 = vmul.f32 %v1176_v11, %v1161_v62  ;;  %v1202_v27 = vmul.f32 2.1237322e-06, %v1201_v12  ;;  %v1213_v15 = vmul.f32 3.8918573e-05, %v1201_v12  ;;  %v1166_v23 = vmul.f32 %v1165_v16, %v1161_v62 }
 0x7bb   :  { %v1178_v17 = vadd.f32 0.112945676, %v1177_v13  ;;  %v1203_v18 = vadd.f32 0.00028619796, %v1202_v27  ;;  %v1214_v35 = vadd.f32 0.001143296, %v1213_v15 }
 0x7bc   :  { %v1167_v31 = vadd.f32 0.05243302, %v1166_v23 }
 0x7bd   :  { %v1179_v19 = vmul.f32 %v1178_v17, %v1161_v62  ;;  %v1204_v22 = vmul.f32 %v1203_v18, %v1201_v12  ;;  %v1215_v21 = vmul.f32 %v1214_v35, %v1201_v12 }
 0x7be   :  { %v1168_v39 = vmul.f32 %v1167_v31, %v1161_v62 }
 0x7bf   :  { %v1180_v24 = vadd.f32 0.4994258, %v1179_v19  ;;  %v1205_v25 = vadd.f32 0.0036580483, %v1204_v22  ;;  %v1216_v26 = vadd.f32 0.014752088, %v1215_v21 }
 0x7c0   :  { %v1169_v45 = vadd.f32 0.18741608, %v1168_v39  ;;  %v1157_v22 = vmul.f32 0.5, %v3123_v2 }
 0x7c1   :  { %v1181_v28 = vmul.f32 %v1180_v24, %v1161_v62  ;;  %v1217_v30 = vmul.f32 %v1216_v26, %v1201_v12  ;;  %v1206_v34 = vmul.f32 %v1205_v25, %v1201_v12  ;;  %v1253_v26 = vperm.slane %v2972_v9, 5 }
 0x7c2   :  { %v1170_v50 = vmul.f32 %v1169_v45, %v1161_v62 }
 0x7c3   :  { %v1182_v33 = vadd.f32 1.0, %v1181_v28  ;;  %v1218_v36 = vadd.f32 0.112945676, %v1217_v30  ;;  %v1207_v40 = vadd.f32 0.05243302, %v1206_v34 }
 0x7c4   :  { %v1171_v58 = vadd.f32 1.1283791, %v1170_v50 }
 0x7c5   :  { %2595 = vrcp.f32 %v1182_v33  ;;  %v1219_v38 = vmul.f32 %v1218_v36, %v1201_v12  ;;  %v1208_v47 = vmul.f32 %v1207_v40, %v1201_v12  ;;  %v1194_v53 = vand.u32 2147483648, %v1182_v33 }
 0x7c6   :  { %v1192_v56 = vand.u32 2147483647, %v1182_v33  ;;  %vm1188_vm10 = vweird.f32 %v1182_v33  ;;  %v1172_v6 = vmul.f32 %v1171_v58, %v3119_v60 }
 0x7c7   :  { %v1220_v41 = vadd.f32 0.4994258, %v1219_v38  ;;  %v1209_v54 = vadd.f32 0.18741608, %v1208_v47  ;;  %v1195_v0 = vor.u32 1.1754944e-38, %v1194_v53  ;;  %v2487_v47 = vld [vmem:[%s3355_s3 + $0x10] sm:$0xff] }
 0x7c8   :  { %vm1193_vm1 = vcmp.eq.f32.partialorder %v1192_v56, 8.507059e+37 }
 0x7c9   :  { %v1221_v42 = vmul.f32 %v1220_v41, %v1201_v12  ;;  %v1210_v1 = vmul.f32 %v1209_v54, %v1201_v12 }
 0x7cb   :  { %v2596_v44 = vpop.eup %2595  ;;  %v1222_v48 = vadd.f32 1.0, %v1221_v42  ;;  %v1211_v62 = vadd.f32 1.1283791, %v1210_v1  ;;  %v2488_v42 = vld [vmem:[%s3355_s3 + $0x18] sm:$0xff]  ;;  %v3175_v1 = vld [vmem:[%s3354_s2 + $0x8] sm:$0x3f] }
 0x7cc   :  { %v1184_v46 = vmul.f32 %v2596_v44, %v1182_v33  ;;  %vm1189_vm9 = vweird.f32 %v2596_v44  ;;  %1382 = vmatpush.bf16.msra.mxu1 %v2488_v42 }
 0x7cd   :  { %2597 = vrcp.f32 %v1222_v48  ;;  %vm1190_vm0 = vmor %vm1188_vm10, %vm1189_vm9  ;;  %v1234_v8 = vand.u32 2147483648, %v1222_v48  ;;  %v1232_v14 = vand.u32 2147483647, %v1222_v48  ;;  %vm1228_vm5 = vweird.f32 %v1222_v48 }
 0x7ce   :  { %v1185_v49 = vsub.f32 1.0, %v1184_v46  ;;  %v1212_v17 = vmul.f32 %v1211_v62, %v3126_v32  ;;  %vm1278_vm9 = vcmask 523264  }
 0x7cf   :  { %v1235_v15 = vor.u32 1.1754944e-38, %v1234_v8  ;;  %vm1233_vm7 = vcmp.eq.f32.partialorder %v1232_v14, 8.507059e+37 }
 0x7d0   :  { %v1186_v52 = vmul.f32 %v2596_v44, %v1185_v49  ;;  %1383 = vmatpush.bf16.msra.mxu1 %v2487_v47 }
 0x7d2   :  { %v1187_v57 = vadd.f32 %v2596_v44, %v1186_v52 }
 0x7d3   :  { %v2598_v61 = vpop.eup %2597 }
 0x7d4   :  { %v1191_v63 = vsel %vm1190_vm0, %v2596_v44, %v1187_v57  ;;  %v1224_v3 = vmul.f32 %v2598_v61, %v1222_v48  ;;  %vm1229_vm4 = vweird.f32 %v2598_v61 }
 0x7d5   :  { %v1196_v4 = vsel %vm1193_vm1, %v1195_v0, %v1191_v63  ;;  %vm1230_vm6 = vmor %vm1228_vm5, %vm1229_vm4 }
 0x7d6   :  { %v1225_v7 = vsub.f32 1.0, %v1224_v3  ;;  %v1197_v11 = vmul.f32 %v1196_v4, %v1172_v6 }
 0x7d8   :  { %v1226_v13 = vmul.f32 %v2598_v61, %v1225_v7  ;;  %v2316_v16 = vclamps-f32 %v1197_v11, 1.0  ;;  %v1344_v7 = vperm.slane %v3175_v1, 0 }
 0x7da   :  { %v1227_v27 = vadd.f32 %v2598_v61, %v1226_v13  ;;  %v1240_v19 = vadd.f32 1.0, %v2316_v16  ;;  %v1347_v13 = vperm.slane %v3175_v1, 1 }
 0x7dc   :  { %v1231_v12 = vsel %vm1230_vm6, %v2598_v61, %v1227_v27  ;;  %v1242_v23 = vmul.f32 %v1240_v19, %v1156_v20 }
 0x7dd   :  { %v1236_v18 = vsel %vm1233_vm7, %v1235_v15, %v1231_v12 }
 0x7de   :  { %v1237_v35 = vmul.f32 %v1236_v18, %v1212_v17 }
 0x7e0   :  { %v2317_v60 = vclamps-f32 %v1237_v35, 1.0  ;;  %v2548_v35 = vld [vmem:[%s3356_s4 + $0x1] ss:$0 sm:$0xff]  ;;  %s2687_s4 = smov [#allocation2]  }
 0x7e2   :  { %v1241_v21 = vadd.f32 1.0, %v2317_v60 }
 0x7e4   :  { %v1243_v24 = vmul.f32 %v1241_v21, %v1157_v22 }
 0x7e6   :  { %v1244_v25 = vpack.c.bf16 %v1243_v24, %v1242_v23 }
 0x7e8   :  { %2334 = vmatmul.msk.bf16.vlgmr.msra.gmra.mxu0 %vm1278_vm9, %v1244_v25 }
 0x865   :  { %v1291_v32 = vpop.f32.mrf.mxu0 }
 0x866   :  { %v1292_v28 = vadd.f32 %v1291_v32, %v1253_v26 }
 0x868   :  { %v3149_v29 = vadd.f32 %v1292_v28, %v3087_v5 }
 0x86a   :  { %v1300_v30 = vsel %vm617_vm2, %v3149_v29, 0.0 }
 0x86b   :  { %1301 = vadd.xlane.f32.xlu0 %v1300_v30 }
 0x86d   :  { %v1293_v59 = vpop.f32.mrf.mxu0 }
 0x86e   :  { %v1294_v2 = vadd.f32 %v1293_v59, %v1253_v26 }
 0x870   :  { %v3154_v31 = vadd.f32 %v1294_v2, %v3092_v10 }
 0x872   :  { %v1303_v33 = vsel %vm621_vm3, %v3154_v31, 0.0 }
 0x873   :  { %1304 = vadd.xlane.f32.xlu0 %v1303_v33 }
 0x8de   :  { %v1302_v34 = vpop.xlane.xlu0 %1301 }
 0x8df   :  { %v1306_v9 = vmul.f32 %v1302_v34, %v2953_v43 }
 0x8e1   :  { %v1308_v36 = vsub.f32 %v3149_v29, %v1306_v9 }
 0x8e3   :  { %v1310_v5 = vmul.f32 %v1308_v36, %v1308_v36 }
 0x8e5   :  { %v1312_v37 = vsel %vm617_vm2, %v1310_v5, 0.0 }
 0x8e6   :  { %1313 = vadd.xlane.f32.xlu0 %v1312_v37  ;;  %v1305_v38 = vpop.xlane.xlu0 %1304 }
 0x8e7   :  { %v1307_v39 = vmul.f32 %v1305_v38, %v2953_v43 }
 0x8e9   :  { %v1309_v40 = vsub.f32 %v3154_v31, %v1307_v39 }
 0x8eb   :  { %v1311_v10 = vmul.f32 %v1309_v40, %v1309_v40 }
 0x8ed   :  { %v1315_v41 = vsel %vm621_vm3, %v1311_v10, 0.0 }
 0x8ee   :  { %1316 = vadd.xlane.f32.xlu1 %v1315_v41 }
 0x959   :  { %v1314_v44 = vpop.xlane.xlu0 %1313 }
 0x95a   :  { %v1318_v45 = vmul.f32 %v1314_v44, %v2953_v43 }
 0x95c   :  { %v1320_v46 = vadd.f32 1e-06, %v1318_v45 }
 0x95e   :  { %2599 = vrsqrt.f32 %v1320_v46  ;;  %vm1328_vm0 = vweird.f32 %v1320_v46 }
 0x961   :  { %v1317_v48 = vpop.xlane.xlu1 %1316 }
 0x962   :  { %v1319_v49 = vmul.f32 %v1317_v48, %v2953_v43 }
 0x964   :  { %v2600_v50 = vpop.eup %2599  ;;  %v1321_v52 = vadd.f32 1e-06, %v1319_v49 }
 0x965   :  { %v1323_v53 = vmul.f32 %v2600_v50, %v1320_v46  ;;  %vm1329_vm10 = vweird.f32 %v2600_v50 }
 0x966   :  { %2601 = vrsqrt.f32 %v1321_v52  ;;  %vm1330_vm1 = vmor %vm1328_vm0, %vm1329_vm10  ;;  %vm1338_vm5 = vweird.f32 %v1321_v52 }
 0x967   :  { %v1324_v54 = vmul.f32 %v2600_v50, %v1323_v53 }
 0x969   :  { %v1325_v56 = vmul.f32 0.5, %v1324_v54 }
 0x96b   :  { %v1326_v57 = vsub.f32 1.5, %v1325_v56 }
 0x96c   :  { %v2602_v58 = vpop.eup %2601 }
 0x96d   :  { %v1327_v61 = vmul.f32 %v2600_v50, %v1326_v57  ;;  %v1333_v63 = vmul.f32 %v2602_v58, %v1321_v52  ;;  %vm1339_vm4 = vweird.f32 %v2602_v58 }
 0x96e   :  { %vm1340_vm6 = vmor %vm1338_vm5, %vm1339_vm4 }
 0x96f   :  { %v1334_v0 = vmul.f32 %v2602_v58, %v1333_v63  ;;  %v1331_v3 = vsel %vm1330_vm1, %v2600_v50, %v1327_v61 }
 0x970   :  { %v1342_v62 = vmul.f32 %v1331_v3, %v1308_v36 }
 0x971   :  { %v1335_v4 = vmul.f32 0.5, %v1334_v0 }
 0x972   :  { %v1345_v14 = vmul.f32 %v1344_v7, %v1342_v62 }
 0x973   :  { %v1336_v6 = vsub.f32 1.5, %v1335_v4 }
 0x974   :  { %v1348_v16 = vadd.f32 %v1347_v13, %v1345_v14 }
 0x975   :  { %v1337_v8 = vmul.f32 %v2602_v58, %v1336_v6 }
 0x977   :  { %v1341_v11 = vsel %vm1340_vm6, %v2602_v58, %v1337_v8 }
 0x978   :  { %v1343_v27 = vmul.f32 %v1341_v11, %v1309_v40 }
 0x97a   :  { %v1346_v15 = vmul.f32 %v1344_v7, %v1343_v27 }
 0x97c   :  { %v1349_v17 = vadd.f32 %v1347_v13, %v1346_v15 }
 0x97e   :  { %v1350_v12 = vpack.c.bf16 %v1349_v17, %v1348_v16 }
 0x980   :  { %2349 = vmatmul.msk.bf16.vlgmr.msra.gmra.mxu1 %vm617_vm2, %v1350_v12 }
 0x9fd   :  { %v1385_v18 = vpop.f32.mrf.mxu1 }
 0x9fe   :  { %v1386_v19 = vadd.f32 %v2548_v35, %v1385_v18 }
 0xa00   :  { %v1390_v20 = vpack.c.bf16 %v1386_v19, %v1386_v19 }
 0xa02   :  { %v1394_v23 = vunpack.c.l.b16 %v1390_v20 }
 0xa05   :  { %v1387_v60 = vpop.f32.mrf.mxu1 }
 0xa06   :  { %v1388_v22 = vadd.f32 %v2548_v35, %v1387_v60 }
 0xa08   :  { %v1391_v21 = vpack.c.bf16 %v1388_v22, %v1388_v22 }
 0xa0a   :  { %v1395_v24 = vunpack.c.l.b16 %v1391_v21 }
 0xa0c   :  { %v3183_v25 = vpack.c.b16 %v1395_v24, %v1394_v23 }
 0xa0e   :  { %1535 = vrot.lane.b32.xlu1 %v3183_v25, %s2673_s30  ;;  %1466 = vrot.lane.b32.xlu0 %v3183_v25, %s2675_s14 }
 0xa0f   :  { %1397 = vrot.lane.b32.xlu2 %v3183_v25, %s2674_s13 }
 0xa16   :  { %1604 = vrot.lane.b32.xlu1 %v3183_v25, %s2677_s16  ;;  %1464 = vrot.lane.b32.xlu0 %v3183_v25, %s2672_s29  ;;  %s2045_s29 = sshll.u32 %s2687_s4, 4  ;;  %s2046_s29 = int_to_ptr.vmem [resolvable:$true] %s2045_s29 }
 0xa17   :  { %1533 = vrot.lane.b32.xlu2 %v3183_v25, %s2676_s15 }
 0xa1e   :  { %1602 = vrot.lane.b32.xlu0 %v3183_v25, %s2678_s17 }
 0xa69   :  { %v1398_v26 = vpop.permute.xlu2 %1397 }
 0xa6a   :  { %v1403_v32 = vsel %vm723_vm11, %v1398_v26, 0 }
 0xa6b   :  { %1412 = vmatpush.bf16.xpose.msrb.mxu2 %v1403_v32 }
 0xa71   :  { %v1534_v33 = vpop.permute.xlu2 %1533 }
 0xa72   :  { %2350 = vmatmul.msk.bf16.vlgmr.msrb.gmra.mxu2 %vm723_vm11, %v3183_v25 }
 0xa80   :  { %v1536_v28 = vpop.permute.xlu1 %1535  ;;  %v1467_v30 = vpop.permute.xlu0 %1466 }
 0xa81   :  { %v1541_v59 = vsel %vm723_vm11, %v1536_v28, 0  ;;  %v1472_v2 = vsel %vm723_vm11, %v1467_v30, 0 }
 0xa82   :  { %1481 = vmatpush.bf16.xpose.msrb.mxu0 %v1472_v2  ;;  %1550 = vmatpush.bf16.xpose.msra.mxu2 %v1541_v59 }
 0xa88   :  { %v1605_v34 = vpop.permute.xlu1 %1604  ;;  %v1465_v9 = vpop.permute.xlu0 %1464 }
 0xa89   :  { %v1610_v36 = vsel %vm723_vm11, %v1605_v34, 0  ;;  %2352 = vmatmul.msk.bf16.vlgmr.msrb.gmra.mxu0 %vm723_vm11, %v1465_v9  ;;  %2354 = vmatmul.msk.bf16.vlgmr.msra.gmra.mxu2 %vm723_vm11, %v1534_v33 }
 0xa8a   :  { %1619 = vmatpush.bf16.xpose.msra.mxu0 %v1610_v36 }
 0xa90   :  { %v1603_v5 = vpop.permute.xlu0 %1602 }
 0xa99   :  { %2356 = vmatmul.msk.bf16.vlgmr.msra.gmra.mxu0 %vm723_vm11, %v1603_v5 }
 0xaf5   :  { %v1414_v37 = vpop.f32.mrf.mxu2 }
 0xaf6   :  { %v1415_v38 = vadd.f32 %v1414_v37, %v3005_v51 }
 0xaf8   :  { %v1419_v39 = vsel %vm744_vm8, %v1415_v38, -inf }
 0xaf9   :  { %1420 = vmax.xlane.f32.xlu2 %v1419_v39 }
 0xafd   :  { %v1416_v40 = vpop.f32.mrf.mxu2 }
 0xafe   :  { %v1417_v10 = vadd.f32 %v1416_v40, %v3009_v55 }
 0xb00   :  { %v1422_v41 = vsel %vm748_vm12, %v1417_v10, -inf }
 0xb01   :  { %1423 = vmax.xlane.f32.xlu1 %v1422_v41 }
 0xb06   :  { %v1483_v42 = vpop.f32.mrf.mxu0 }
 0xb07   :  { %v1484_v44 = vadd.f32 %v1483_v42, %v3005_v51 }
 0xb09   :  { %v1488_v45 = vsel %vm744_vm8, %v1484_v44, -inf }
 0xb0a   :  { %1489 = vmax.xlane.f32.xlu0 %v1488_v45 }
 0xb0c   :  { %v1552_v46 = vpop.f32.mrf.mxu2 }
 0xb0d   :  { %v1553_v47 = vadd.f32 %v1552_v46, %v3005_v51 }
 0xb0e   :  { %v1485_v48 = vpop.f32.mrf.mxu0 }
 0xb0f   :  { %v1486_v49 = vadd.f32 %v1485_v48, %v3009_v55  ;;  %v1557_v50 = vsel %vm744_vm8, %v1553_v47, -inf }
 0xb10   :  { %1558 = vmax.xlane.f32.xlu1 %v1557_v50 }
 0xb11   :  { %v1491_v52 = vsel %vm748_vm12, %v1486_v49, -inf }
 0xb12   :  { %1492 = vmax.xlane.f32.xlu2 %v1491_v52 }
 0xb14   :  { %v1554_v53 = vpop.f32.mrf.mxu2 }
 0xb15   :  { %v1555_v54 = vadd.f32 %v1554_v53, %v3009_v55 }
 0xb16   :  { %v1621_v56 = vpop.f32.mrf.mxu0 }
 0xb17   :  { %v1622_v57 = vadd.f32 %v1621_v56, %v3005_v51  ;;  %v1560_v58 = vsel %vm748_vm12, %v1555_v54, -inf }
 0xb18   :  { %1561 = vmax.xlane.f32.xlu0 %v1560_v58 }
 0xb19   :  { %v1626_v61 = vsel %vm744_vm8, %v1622_v57, -inf }
 0xb1a   :  { %1627 = vmax.xlane.f32.xlu2 %v1626_v61 }
 0xb1e   :  { %v1623_v63 = vpop.f32.mrf.mxu0 }
 0xb1f   :  { %v1624_v0 = vadd.f32 %v1623_v63, %v3009_v55 }
 0xb21   :  { %v1629_v3 = vsel %vm748_vm12, %v1624_v0, -inf }
 0xb22   :  { %1630 = vmax.xlane.f32.xlu1 %v1629_v3 }
 0xb6c   :  { %v1421_v4 = vpop.xlane.xlu2 %1420 }
 0xb6d   :  { %v1425_v6 = vsub.f32 %v1415_v38, %v1421_v4 }
 0xb6f   :  { %v1427_v7 = vmul.f32 1.442695, %v1425_v6 }
 0xb71   :  { %2603 = vpow2.f32 %v1427_v7 }
 0xb74   :  { %v1424_v62 = vpop.xlane.xlu1 %1423 }
 0xb75   :  { %v1426_v8 = vsub.f32 %v1417_v10, %v1424_v62 }
 0xb77   :  { %v2604_v11 = vpop.eup %2603  ;;  %v1429_v51 = vmul.f32 1.442695, %v1426_v8 }
 0xb78   :  { %v1431_v13 = vsel %vm744_vm8, %v2604_v11, 0.0 }
 0xb79   :  { %2605 = vpow2.f32 %v1429_v51  ;;  %1432 = vadd.xlane.f32.xlu0 %v1431_v13 }
 0xb7d   :  { %v1490_v14 = vpop.xlane.xlu0 %1489 }
 0xb7e   :  { %v1494_v27 = vsub.f32 %v1484_v44, %v1490_v14 }
 0xb7f   :  { %v2606_v15 = vpop.eup %2605 }
 0xb80   :  { %v1496_v16 = vmul.f32 1.442695, %v1494_v27  ;;  %v1434_v55 = vsel %vm748_vm12, %v2606_v15, 0.0 }
 0xb81   :  { %1435 = vadd.xlane.f32.xlu2 %v1434_v55 }
 0xb82   :  { %2607 = vpow2.f32 %v1496_v16 }
 0xb83   :  { %v1559_v60 = vpop.xlane.xlu1 %1558 }
 0xb84   :  { %v1563_v23 = vsub.f32 %v1553_v47, %v1559_v60 }
 0xb85   :  { %v1493_v17 = vpop.xlane.xlu2 %1492 }
 0xb86   :  { %v1495_v12 = vsub.f32 %v1486_v49, %v1493_v17  ;;  %v1565_v32 = vmul.f32 1.442695, %v1563_v23 }
 0xb88   :  { %v2608_v18 = vpop.eup %2607  ;;  %v1498_v35 = vmul.f32 1.442695, %v1495_v12 }
 0xb89   :  { %v1500_v19 = vsel %vm744_vm8, %v2608_v18, 0.0 }
 0xb8a   :  { %2609 = vpow2.f32 %v1498_v35  ;;  %1501 = vadd.xlane.f32.xlu1 %v1500_v19 }
 0xb8b   :  { %v1562_v28 = vpop.xlane.xlu0 %1561 }
 0xb8c   :  { %v1564_v59 = vsub.f32 %v1555_v54, %v1562_v28 }
 0xb8d   :  { %v1628_v20 = vpop.xlane.xlu2 %1627 }
 0xb8e   :  { %v1632_v22 = vsub.f32 %v1622_v57, %v1628_v20  ;;  %v1567_v33 = vmul.f32 1.442695, %v1564_v59  ;;  %v2489_v59 = vld [vmem:[%s3357_s5 + $0x10] sm:$0xff] }
 0xb90   :  { %v2610_v21 = vpop.eup %2609  ;;  %v1634_v24 = vmul.f32 1.442695, %v1632_v22 }
 0xb91   :  { %v1503_v26 = vsel %vm748_vm12, %v2610_v21, 0.0 }
 0xb92   :  { %2611 = vpow2.f32 %v1634_v24  ;;  %1504 = vadd.xlane.f32.xlu0 %v1503_v26 }
 0xb93   :  { %2613 = vpow2.f32 %v1565_v32 }
 0xb94   :  { %2615 = vpow2.f32 %v1567_v33 }
 0xb95   :  { %v1631_v37 = vpop.xlane.xlu1 %1630 }
 0xb96   :  { %v1633_v38 = vsub.f32 %v1624_v0, %v1631_v37 }
 0xb98   :  { %v3228_v30 = vpop.eup %2611  ;;  %v1636_v39 = vmul.f32 1.442695, %v1633_v38 }
 0xb99   :  { %1442 = vrot.lane.b32.xlu2 %v3183_v25, %s2680_s18  ;;  %v1638_v2 = vsel %vm744_vm8, %v3228_v30, 0.0  ;;  %v2614_v34 = vpop.eup %2613 }
 0xb9a   :  { %1639 = vadd.xlane.f32.xlu0 %v1638_v2  ;;  %v1569_v9 = vsel %vm744_vm8, %v2614_v34, 0.0  ;;  %v2616_v36 = vpop.eup %2615  ;;  %2617 = vpow2.f32 %v1636_v39 }
 0xb9b   :  { %v1572_v5 = vsel %vm748_vm12, %v2616_v36, 0.0 }
 0xba0   :  { %v2618_v40 = vpop.eup %2617 }
 0xba1   :  { %v1641_v10 = vsel %vm748_vm12, %v2618_v40, 0.0 }
 0xba2   :  { %1570 = vadd.xlane.f32.xlu0 %v1569_v9 }
 0xba3   :  { %1511 = vrot.lane.b32.xlu1 %v3183_v25, %s2681_s19 }
 0xbaa   :  { %1573 = vadd.xlane.f32.xlu0 %v1572_v5 }
 0xbab   :  { %1649 = vrot.lane.b32.xlu1 %v3183_v25, %s2683_s21 }
 0xbbe   :  { %1580 = vrot.lane.b32.xlu0 %v3183_v25, %s2682_s20 }
 0xbc2   :  { %1642 = vadd.xlane.f32.xlu2 %v1641_v10 }
 0xbec   :  { %v1433_v41 = vpop.xlane.xlu0 %1432 }
 0xbed   :  { %2619 = vrcp.f32 %v1433_v41 }
 0xbf3   :  { %v2620_v44 = vpop.eup %2619 }
 0xbf4   :  { %v1436_v42 = vpop.xlane.xlu2 %1435  ;;  %v1439_v46 = vmul.f32 %v2620_v44, %v2604_v11 }
 0xbf5   :  { %2621 = vrcp.f32 %v1436_v42 }
 0xbfb   :  { %v2622_v45 = vpop.eup %2621 }
 0xbfc   :  { %v1440_v47 = vmul.f32 %v2622_v45, %v2606_v15  ;;  %v1443_v48 = vpop.permute.xlu2 %1442 }
 0xbfd   :  { %v1448_v49 = vsel %vm774_vm13, %v1443_v48, 0  ;;  %v1502_v25 = vpop.xlane.xlu1 %1501 }
 0xbfe   :  { %v1441_v50 = vpack.c.bf16 %v1440_v47, %v1439_v46  ;;  %1457 = vmatpush.bf16.msrb.mxu3 %v1448_v49  ;;  %v1707_v47 = vperm.slane %v3175_v1, 4 }
 0xc01   :  { %2351 = vmatmul.msk.bf16.vlgmr.msrb.gmra.mxu3 %vm744_vm8, %v1441_v50 }
 0xc05   :  { %v1505_v52 = vpop.xlane.xlu0 %1504 }
 0xc06   :  { %2623 = vrcp.f32 %v1505_v52 }
 0xc07   :  { %2625 = vrcp.f32 %v1502_v25 }
 0xc0c   :  { %v2624_v54 = vpop.eup %2623 }
 0xc0d   :  { %v1640_v53 = vpop.xlane.xlu0 %1639  ;;  %v2626_v56 = vpop.eup %2625  ;;  %v1509_v57 = vmul.f32 %v2624_v54, %v2610_v21 }
 0xc0e   :  { %v1508_v61 = vmul.f32 %v2626_v56, %v2608_v18 }
 0xc10   :  { %v1510_v0 = vpack.c.bf16 %v1509_v57, %v1508_v61 }
 0xc15   :  { %v1512_v58 = vpop.permute.xlu1 %1511  ;;  %v1571_v3 = vpop.xlane.xlu0 %1570 }
 0xc16   :  { %v1517_v63 = vsel %vm774_vm13, %v1512_v58, 0 }
 0xc17   :  { %1526 = vmatpush.bf16.msrb.mxu1 %v1517_v63 }
 0xc1a   :  { %2353 = vmatmul.msk.bf16.vlgmr.msrb.gmra.mxu1 %vm744_vm8, %v1510_v0 }
 0xc1d   :  { %v1650_v4 = vpop.permute.xlu1 %1649  ;;  %v1574_v7 = vpop.xlane.xlu0 %1573 }
 0xc1e   :  { %v1655_v6 = vsel %vm774_vm13, %v1650_v4, 0  ;;  %2627 = vrcp.f32 %v1574_v7 }
 0xc1f   :  { %1664 = vmatpush.bf16.msra.mxu1 %v1655_v6  ;;  %2629 = vrcp.f32 %v1571_v3 }
 0xc20   :  { %2631 = vrcp.f32 %v1640_v53 }
 0xc24   :  { %v2628_v62 = vpop.eup %2627 }
 0xc25   :  { %v2630_v8 = vpop.eup %2629  ;;  %v1578_v11 = vmul.f32 %v2628_v62, %v2616_v36 }
 0xc26   :  { %v1577_v13 = vmul.f32 %v2630_v8, %v2614_v34  ;;  %v2632_v16 = vpop.eup %2631 }
 0xc27   :  { %v1646_v17 = vmul.f32 %v2632_v16, %v3228_v30  ;;  %v2490_v30 = vld [vmem:[%s3357_s5 + $0x18] sm:$0xff]  ;;  %s2047_s5 = sshll.u32 %s3364_s12, 4  ;;  %s2048_s5 = int_to_ptr.hbm [resolvable:$true] %s2047_s5 }
 0xc28   :  { %v1579_v27 = vpack.c.bf16 %v1578_v11, %v1577_v13  ;;  %1729 = vmatpush.bf16.msrb.mxu2 %v2490_v30  ;;  %v2491_v11 = vld [vmem:[%s3358_s6 + $0x10] sm:$0xff] }
 0xc2c   :  { %1730 = vmatpush.bf16.msrb.mxu2 %v2489_v59 }
 0xc30   :  { %v1581_v51 = vpop.permute.xlu0 %1580 }
 0xc31   :  { %v1586_v14 = vsel %vm774_vm13, %v1581_v51, 0 }
 0xc32   :  { %1595 = vmatpush.bf16.msra.mxu3 %v1586_v14 }
 0xc35   :  { %v1643_v15 = vpop.xlane.xlu2 %1642  ;;  %2355 = vmatmul.msk.bf16.vlgmr.msra.gmra.mxu3 %vm744_vm8, %v1579_v27 }
 0xc36   :  { %2633 = vrcp.f32 %v1643_v15 }
 0xc3c   :  { %v2634_v55 = vpop.eup %2633 }
 0xc3d   :  { %v1647_v12 = vmul.f32 %v2634_v55, %v2618_v40 }
 0xc3f   :  { %v1648_v18 = vpack.c.bf16 %v1647_v12, %v1646_v17 }
 0xc41   :  { %2357 = vmatmul.msk.bf16.vlgmr.msra.gmra.mxu1 %vm744_vm8, %v1648_v18 }
 0xc84   :  { %v1459_v20 = vpop.f32.mrf.mxu3 }
 0xc8c   :  { %v1461_v22 = vpop.f32.mrf.mxu3 }
 0xc97   :  { %v1528_v35 = vpop.f32.mrf.mxu1 }
 0xc9f   :  { %v1530_v19 = vpop.f32.mrf.mxu1 }
 0xca0   :  { %v2531_v60 = vpack.i.bf16 %v1530_v19, %v1528_v35 }
 0xca2   :  { %2532 = vrot.lane.b32.xlu1 %v2531_v60, %s2684_s22 }
 0xcb8   :  { %v1597_v21 = vpop.f32.mrf.mxu3 }
 0xcbe   :  { %v1666_v23 = vpop.f32.mrf.mxu1 }
 0xcc0   :  { %v1599_v24 = vpop.f32.mrf.mxu3 }
 0xcc1   :  { %v2536_v26 = vpack.i.bf16 %v1599_v24, %v1597_v21 }
 0xcc3   :  { %2537 = vrot.lane.b32.xlu1 %v2536_v26, %s2685_s0 }
 0xcc6   :  { %v1668_v32 = vpop.f32.mrf.mxu1 }
 0xcc7   :  { %v2541_v28 = vpack.i.bf16 %v1668_v32, %v1666_v23  ;;  %v1783_v23 = vperm.slane %v3175_v1, 2 }
 0xcc9   :  { %2542 = vrot.lane.b32.xlu0 %v2541_v28, %s2686_s1  ;;  %v1786_v28 = vperm.slane %v3175_v1, 3 }
 0xd14   :  { %v2533_v2 = vpop.permute.xlu1 %2532 }
 0xd15   :  { %v2535_v34 = vunpack.i.h.bf16 %v2533_v2  ;;  %v2534_v9 = vunpack.i.l.bf16 %v2533_v2 }
 0xd17   :  { %v1695_v38 = vsel %vm723_vm11, %v1459_v20, %v2534_v9  ;;  %v1696_v39 = vsel %vm723_vm11, %v1461_v22, %v2535_v34 }
 0xd35   :  { %v2538_v33 = vpop.permute.xlu1 %2537 }
 0xd36   :  { %v2540_v36 = vunpack.i.h.bf16 %v2538_v33  ;;  %v2539_v5 = vunpack.i.l.bf16 %v2538_v33 }
 0xd38   :  { %v1698_v41 = vsel %vm1025_vm14, %v1696_v39, %v2540_v36  ;;  %v1697_v42 = vsel %vm1025_vm14, %v1695_v38, %v2539_v5  ;;  %v2549_v36 = vld [vmem:[%s3359_s7 + $0x1] ss:$0 sm:$0xff] }
 0xd3b   :  { %v2543_v37 = vpop.permute.xlu0 %2542 }
 0xd3c   :  { %v2545_v40 = vunpack.i.h.bf16 %v2543_v37  ;;  %v2544_v10 = vunpack.i.l.bf16 %v2543_v37 }
 0xd3e   :  { %v1700_v44 = vsel %vm1028_vm15, %v1698_v41, %v2545_v40  ;;  %v1699_v45 = vsel %vm1028_vm15, %v1697_v42, %v2544_v10 }
 0xd3f   :  { %v1701_v46 = vpack.c.bf16 %v1700_v44, %v1699_v45 }
 0xd41   :  { %2370 = vmatmul.msk.bf16.vlgmr.msrb.gmra.mxu2 %vm617_vm2, %v1701_v46 }
 0xdc4   :  { %v1732_v48 = vpop.f32.mrf.mxu2 }
 0xdc5   :  { %v1733_v49 = vadd.f32 %v1732_v48, %v1707_v47 }
 0xdc7   :  { %v3270_v50 = vadd.f32 %v1733_v49, %v3149_v29 }
 0xdc9   :  { %v1739_v52 = vsel %vm617_vm2, %v3270_v50, 0.0 }
 0xdca   :  { %1740 = vadd.xlane.f32.xlu1 %v1739_v52 }
 0xdcc   :  { %v1734_v25 = vpop.f32.mrf.mxu2 }
 0xdcd   :  { %v1735_v53 = vadd.f32 %v1734_v25, %v1707_v47 }
 0xdcf   :  { %v1738_v54 = vadd.f32 %v1735_v53, %v3154_v31  ;;  %v2492_v31 = vld [vmem:[%s3358_s6 + $0x18] sm:$0xff] }
 0xdd0   :  { %1821 = vmatpush.bf16.msrb.mxu3 %v2492_v31 }
 0xdd1   :  { %v1742_v56 = vsel %vm621_vm3, %v1738_v54, 0.0 }
 0xdd2   :  { %1743 = vadd.xlane.f32.xlu0 %v1742_v56  ;;  %v2496_v56 = vld [vmem:[%s3360_s8 + $0x38] sm:$0xff] }
 0xdd3   :  { %1959 = vmatpush.bf16.msrb.mxu0 %v2496_v56 }
 0xdd4   :  { %1822 = vmatpush.bf16.msrb.mxu3 %v2491_v11 }
 0xe3d   :  { %v1741_v57 = vpop.xlane.xlu1 %1740 }
 0xe3e   :  { %v1745_v58 = vmul.f32 %v1741_v57, %v2953_v43 }
 0xe40   :  { %v1747_v61 = vsub.f32 %v3270_v50, %v1745_v58 }
 0xe42   :  { %v1749_v63 = vmul.f32 %v1747_v61, %v1747_v61 }
 0xe44   :  { %v1751_v29 = vsel %vm617_vm2, %v1749_v63, 0.0 }
 0xe45   :  { %v1744_v0 = vpop.xlane.xlu0 %1743  ;;  %1752 = vadd.xlane.f32.xlu2 %v1751_v29 }
 0xe46   :  { %v1746_v3 = vmul.f32 %v1744_v0, %v2953_v43 }
 0xe48   :  { %v1748_v4 = vsub.f32 %v1738_v54, %v1746_v3 }
 0xe4a   :  { %v1750_v6 = vmul.f32 %v1748_v4, %v1748_v4 }
 0xe4c   :  { %v1754_v7 = vsel %vm621_vm3, %v1750_v6, 0.0 }
 0xe4d   :  { %1755 = vadd.xlane.f32.xlu2 %v1754_v7 }
 0xeb8   :  { %v1753_v62 = vpop.xlane.xlu2 %1752 }
 0xeb9   :  { %v1757_v8 = vmul.f32 %v1753_v62, %v2953_v43 }
 0xebb   :  { %v1759_v51 = vadd.f32 1e-06, %v1757_v8 }
 0xebd   :  { %2635 = vrsqrt.f32 %v1759_v51  ;;  %vm1767_vm8 = vweird.f32 %v1759_v51 }
 0xec0   :  { %v1756_v13 = vpop.xlane.xlu2 %1755 }
 0xec1   :  { %v1758_v14 = vmul.f32 %v1756_v13, %v2953_v43  ;;  %v2494_v13 = vld [vmem:[%s3360_s8 + $0x28] sm:$0xff] }
 0xec3   :  { %v2636_v27 = vpop.eup %2635  ;;  %v1760_v15 = vadd.f32 1e-06, %v1758_v14 }
 0xec4   :  { %v1762_v16 = vmul.f32 %v2636_v27, %v1759_v51  ;;  %vm1768_vm11 = vweird.f32 %v2636_v27 }
 0xec5   :  { %2637 = vrsqrt.f32 %v1760_v15  ;;  %vm1769_vm13 = vmor %vm1767_vm8, %vm1768_vm11  ;;  %vm1777_vm15 = vweird.f32 %v1760_v15 }
 0xec6   :  { %v1763_v55 = vmul.f32 %v2636_v27, %v1762_v16 }
 0xec8   :  { %v1764_v17 = vmul.f32 0.5, %v1763_v55 }
 0xeca   :  { %v1765_v12 = vsub.f32 1.5, %v1764_v17  ;;  %v2493_v17 = vld [vmem:[%s3360_s8 + $0x20] sm:$0xff] }
 0xecb   :  { %v2638_v18 = vpop.eup %2637 }
 0xecc   :  { %v1766_v35 = vmul.f32 %v2636_v27, %v1765_v12  ;;  %v1772_v19 = vmul.f32 %v2638_v18, %v1760_v15  ;;  %vm1778_vm14 = vweird.f32 %v2638_v18 }
 0xecd   :  { %vm1779_vm7 = vmor %vm1777_vm15, %vm1778_vm14 }
 0xece   :  { %v1773_v60 = vmul.f32 %v2638_v18, %v1772_v19  ;;  %v1770_v20 = vsel %vm1769_vm13, %v2636_v27, %v1766_v35  ;;  %vm1972_vm13 = vcmask 1040384  }
 0xecf   :  { %v1781_v24 = vmul.f32 %v1770_v20, %v1747_v61 }
 0xed0   :  { %v1774_v22 = vmul.f32 0.5, %v1773_v60 }
 0xed1   :  { %v1784_v30 = vmul.f32 %v1783_v23, %v1781_v24 }
 0xed2   :  { %v1775_v21 = vsub.f32 1.5, %v1774_v22 }
 0xed3   :  { %v1787_v33 = vadd.f32 %v1786_v28, %v1784_v30 }
 0xed4   :  { %v1776_v26 = vmul.f32 %v2638_v18, %v1775_v21 }
 0xed6   :  { %v1780_v32 = vsel %vm1779_vm7, %v2638_v18, %v1776_v26 }
 0xed7   :  { %v1782_v59 = vmul.f32 %v1780_v32, %v1748_v4  ;;  %v2495_v4 = vld [vmem:[%s3360_s8 + $0x30] sm:$0xff] }
 0xed8   :  { %1960 = vmatpush.bf16.msrb.mxu0 %v2495_v4 }
 0xed9   :  { %v1785_v2 = vmul.f32 %v1783_v23, %v1782_v59 }
 0xedb   :  { %v1788_v34 = vadd.f32 %v1786_v28, %v1785_v2 }
 0xedc   :  { %1961 = vmatpush.bf16.msrb.mxu0 %v2494_v13 }
 0xedd   :  { %v1789_v9 = vpack.c.bf16 %v1788_v34, %v1787_v33 }
 0xedf   :  { %2384 = vmatmul.msk.bf16.vlgmr.msrb.gmra.mxu3 %vm617_vm2, %v1789_v9 }
 0xee0   :  { %1962 = vmatpush.bf16.msrb.mxu0 %v2493_v17 }
 0xf62   :  { %v1824_v5 = vpop.f32.mrf.mxu3 }
 0xf63   :  { %v3295_v37 = vadd.f32 %v2549_v36, %v1824_v5 }
 0xf65   :  { %v3298_v38 = vmul.f32 0.70710677, %v3295_v37 }
 0xf67   :  { %v1833_v39 = vmul.f32 %v3298_v38, %v3298_v38 }
 0xf69   :  { %v1834_v40 = vmin.f32 %v1833_v39, 16.0 }
 0xf6a   :  { %v1826_v10 = vpop.f32.mrf.mxu3 }
 0xf6b   :  { %v1835_v41 = vmul.f32 2.1237322e-06, %v1834_v40  ;;  %v1846_v42 = vmul.f32 3.8918573e-05, %v1834_v40  ;;  %v3302_v44 = vadd.f32 %v2549_v36, %v1826_v10 }
 0xf6d   :  { %v1836_v45 = vadd.f32 0.00028619796, %v1835_v41  ;;  %v1847_v46 = vadd.f32 0.001143296, %v1846_v42  ;;  %v3305_v47 = vmul.f32 0.70710677, %v3302_v44 }
 0xf6f   :  { %v1848_v48 = vmul.f32 %v1847_v46, %v1834_v40  ;;  %v1873_v49 = vmul.f32 %v3305_v47, %v3305_v47  ;;  %v1837_v52 = vmul.f32 %v1836_v45, %v1834_v40 }
 0xf71   :  { %v1849_v25 = vadd.f32 0.014752088, %v1848_v48  ;;  %v1874_v53 = vmin.f32 %v1873_v49, 16.0  ;;  %v1838_v61 = vadd.f32 0.0036580483, %v1837_v52 }
 0xf73   :  { %v1850_v54 = vmul.f32 %v1849_v25, %v1834_v40  ;;  %v1875_v57 = vmul.f32 2.1237322e-06, %v1874_v53  ;;  %v1886_v58 = vmul.f32 3.8918573e-05, %v1874_v53  ;;  %v1839_v31 = vmul.f32 %v1838_v61, %v1834_v40 }
 0xf75   :  { %v1851_v63 = vadd.f32 0.112945676, %v1850_v54  ;;  %v1876_v29 = vadd.f32 0.00028619796, %v1875_v57  ;;  %v1887_v0 = vadd.f32 0.001143296, %v1886_v58 }
 0xf76   :  { %v1840_v27 = vadd.f32 0.05243302, %v1839_v31  ;;  %v1927_v31 = vperm.slane %v3175_v1, 5  ;;  %v2498_v1 = vld [vmem:[%s3362_s10 + $0x8] sm:$0xff] }
 0xf77   :  { %v1852_v3 = vmul.f32 %v1851_v63, %v1834_v40  ;;  %v1877_v6 = vmul.f32 %v1876_v29, %v1874_v53  ;;  %v1888_v7 = vmul.f32 %v1887_v0, %v1874_v53  ;;  %v1829_v29 = vmul.f32 0.5, %v3295_v37  ;;  %2032 = vmatpush.bf16.msrb.mxu1 %v2498_v1 }
 0xf78   :  { %v1841_v18 = vmul.f32 %v1840_v27, %v1834_v40  ;;  %v1830_v0 = vmul.f32 0.5, %v3302_v44 }
 0xf79   :  { %v1853_v62 = vadd.f32 0.4994258, %v1852_v3  ;;  %v1878_v8 = vadd.f32 0.0036580483, %v1877_v6  ;;  %v1889_v11 = vadd.f32 0.014752088, %v1888_v7 }
 0xf7a   :  { %v1842_v22 = vadd.f32 0.18741608, %v1841_v18 }
 0xf7b   :  { %v1854_v51 = vmul.f32 %v1853_v62, %v1834_v40  ;;  %v1890_v14 = vmul.f32 %v1889_v11, %v1874_v53  ;;  %v1879_v16 = vmul.f32 %v1878_v8, %v1874_v53 }
 0xf7c   :  { %v1843_v32 = vmul.f32 %v1842_v22, %v1834_v40 }
 0xf7d   :  { %v1855_v15 = vadd.f32 1.0, %v1854_v51  ;;  %v1891_v55 = vadd.f32 0.112945676, %v1890_v14  ;;  %v1880_v35 = vadd.f32 0.05243302, %v1879_v16 }
 0xf7e   :  { %v1844_v34 = vadd.f32 1.1283791, %v1843_v32 }
 0xf7f   :  { %2639 = vrcp.f32 %v1855_v15  ;;  %v1892_v12 = vmul.f32 %v1891_v55, %v1874_v53  ;;  %v1881_v23 = vmul.f32 %v1880_v35, %v1874_v53  ;;  %v1867_v30 = vand.u32 2147483648, %v1855_v15 }
 0xf80   :  { %v1865_v2 = vand.u32 2147483647, %v1855_v15  ;;  %vm1861_vm0 = vweird.f32 %v1855_v15  ;;  %v1845_v42 = vmul.f32 %v1844_v34, %v3298_v38 }
 0xf81   :  { %v1893_v19 = vadd.f32 0.4994258, %v1892_v12  ;;  %v1882_v59 = vadd.f32 0.18741608, %v1881_v23  ;;  %v1868_v5 = vor.u32 1.1754944e-38, %v1867_v30 }
 0xf82   :  { %vm1866_vm4 = vcmp.eq.f32.partialorder %v1865_v2, 8.507059e+37  ;;  %v2552_v30 = vld [vmem:[%s3363_s11] ss:$0 sm:$0xff] }
 0xf83   :  { %v1894_v60 = vmul.f32 %v1893_v19, %v1874_v53  ;;  %v1883_v39 = vmul.f32 %v1882_v59, %v1874_v53 }
 0xf85   :  { %v2640_v20 = vpop.eup %2639  ;;  %v1895_v24 = vadd.f32 1.0, %v1894_v60  ;;  %v1884_v40 = vadd.f32 1.1283791, %v1883_v39 }
 0xf86   :  { %v1857_v21 = vmul.f32 %v2640_v20, %v1855_v15  ;;  %vm1862_vm10 = vweird.f32 %v2640_v20 }
 0xf87   :  { %2641 = vrcp.f32 %v1895_v24  ;;  %vm1863_vm1 = vmor %vm1861_vm0, %vm1862_vm10  ;;  %v1907_v46 = vand.u32 2147483648, %v1895_v24  ;;  %v1905_v52 = vand.u32 2147483647, %v1895_v24  ;;  %vm1901_vm6 = vweird.f32 %v1895_v24 }
 0xf88   :  { %v1858_v26 = vsub.f32 1.0, %v1857_v21  ;;  %v1885_v57 = vmul.f32 %v1884_v40, %v3305_v47  ;;  %v2550_v21 = vld [vmem:[%s3361_s9] ss:$0 sm:$0xff] }
 0xf89   :  { %v1908_v54 = vor.u32 1.1754944e-38, %v1907_v46  ;;  %vm1906_vm8 = vcmp.eq.f32.partialorder %v1905_v52, 8.507059e+37 }
 0xf8a   :  { %v1859_v28 = vmul.f32 %v2640_v20, %v1858_v26 }
 0xf8c   :  { %v1860_v33 = vadd.f32 %v2640_v20, %v1859_v28 }
 0xf8d   :  { %v2642_v9 = vpop.eup %2641 }
 0xf8e   :  { %v1864_v36 = vsel %vm1863_vm1, %v2640_v20, %v1860_v33  ;;  %v1897_v10 = vmul.f32 %v2642_v9, %v1895_v24  ;;  %vm1902_vm5 = vweird.f32 %v2642_v9 }
 0xf8f   :  { %v1869_v41 = vsel %vm1866_vm4, %v1868_v5, %v1864_v36  ;;  %vm1903_vm11 = vmor %vm1901_vm6, %vm1902_vm5 }
 0xf90   :  { %v1898_v45 = vsub.f32 1.0, %v1897_v10  ;;  %v1870_v48 = vmul.f32 %v1869_v41, %v1845_v42 }
 0xf92   :  { %v1899_v49 = vmul.f32 %v2642_v9, %v1898_v45  ;;  %v2385_v56 = vclamps-f32 %v1870_v48, 1.0 }
 0xf94   :  { %v1900_v25 = vadd.f32 %v2642_v9, %v1899_v49  ;;  %v1913_v63 = vadd.f32 1.0, %v2385_v56 }
 0xf96   :  { %v1904_v53 = vsel %vm1903_vm11, %v2642_v9, %v1900_v25  ;;  %v1915_v4 = vmul.f32 %v1913_v63, %v1829_v29 }
 0xf97   :  { %v1909_v58 = vsel %vm1906_vm8, %v1908_v54, %v1904_v53 }
 0xf98   :  { %v1910_v61 = vmul.f32 %v1909_v58, %v1885_v57 }
 0xf9a   :  { %v2386_v38 = vclamps-f32 %v1910_v61, 1.0 }
 0xf9c   :  { %v1914_v3 = vadd.f32 1.0, %v2386_v38 }
 0xf9e   :  { %v1916_v6 = vmul.f32 %v1914_v3, %v1830_v0 }
 0xfa0   :  { %v1917_v7 = vpack.c.bf16 %v1916_v6, %v1915_v4 }
 0xfa2   :  { %2411 = vmatmul.msk.bf16.vlgmr.msrb.gmra.mxu0 %vm1278_vm9, %v1917_v7 }
0x101f   :  { %v1964_v62 = vpop.f32.mrf.mxu0 }
0x1020   :  { %v1965_v47 = vadd.f32 %v1964_v62, %v1927_v31 }
0x1022   :  { %v1968_v8 = vadd.f32 %v1965_v47, %v3270_v50  ;;  %v2497_v50 = vld [vmem:[%s3362_s10] sm:$0xff] }
0x1023   :  { %2033 = vmatpush.bf16.msrb.mxu1 %v2497_v50 }
0x1024   :  { %v1970_v11 = vrot.slane %v1968_v8, 4 }
0x1026   :  { %v1973_v51 = vsel %vm1972_vm13, %v1968_v8, %v1970_v11 }
0x1027   :  { %v1966_v13 = vpop.f32.mrf.mxu0  ;;  %v1976_v37 = vsel %vm621_vm3, %v1973_v51, 0.0 }
0x1028   :  { %1977 = vadd.xlane.f32.xlu2 %v1976_v37 }
0x109b   :  { %v1978_v44 = vpop.xlane.xlu2 %1977 }
0x109c   :  { %v1979_v14 = vmul.f32 %v1978_v44, %v2953_v43 }
0x109e   :  { %v1980_v27 = vsub.f32 %v1973_v51, %v1979_v14 }
0x10a0   :  { %v1981_v15 = vmul.f32 %v1980_v27, %v1980_v27 }
0x10a2   :  { %v1982_v16 = vsel %vm621_vm3, %v1981_v15, 0.0 }
0x10a3   :  { %1983 = vadd.xlane.f32.xlu2 %v1982_v16 }
0x1116   :  { %v1984_v55 = vpop.xlane.xlu2 %1983 }
0x1117   :  { %v1985_v17 = vmul.f32 %v1984_v55, %v2953_v43  ;;  %v2551_v43 = vld [vmem:[%s3361_s9 + $0x1] ss:$0 sm:$0xff] }
0x1119   :  { %v1986_v12 = vadd.f32 1e-06, %v1985_v17 }
0x111b   :  { %2643 = vrsqrt.f32 %v1986_v12  ;;  %vm1993_vm9 = vweird.f32 %v1986_v12 }
0x1121   :  { %v2644_v18 = vpop.eup %2643 }
0x1122   :  { %v1988_v35 = vmul.f32 %v2644_v18, %v1986_v12  ;;  %vm1994_vm3 = vweird.f32 %v2644_v18 }
0x1123   :  { %vm1995_vm14 = vmor %vm1993_vm9, %vm1994_vm3 }
0x1124   :  { %v1989_v19 = vmul.f32 %v2644_v18, %v1988_v35 }
0x1126   :  { %v1990_v60 = vmul.f32 0.5, %v1989_v19 }
0x1128   :  { %v1991_v20 = vsub.f32 1.5, %v1990_v60 }
0x112a   :  { %v1992_v22 = vmul.f32 %v2644_v18, %v1991_v20 }
0x112c   :  { %v1996_v23 = vsel %vm1995_vm14, %v2644_v18, %v1992_v22 }
0x112d   :  { %v1997_v24 = vmul.f32 %v1996_v23, %v1980_v27 }
0x112f   :  { %v1999_v26 = vmul.f32 %v2550_v21, %v1997_v24 }
0x1131   :  { %v2001_v32 = vadd.f32 %v2551_v43, %v1999_v26 }
0x1133   :  { %v2002_v28 = vpack.c.bf16 %v2001_v32, %v2001_v32 }
0x1135   :  { %2420 = vmatmul.msk.bf16.vlgmr.msrb.gmra.mxu1 %vm617_vm2, %v2002_v28 }
0x11b2   :  { %v2035_v59 = vpop.f32.mrf.mxu1 }
0x11b3   :  { %v2036_v2 = vadd.f32 %v2552_v30, %v2035_v59 }
0x11b5   :  { %2039 = vst.msk [vmem:[#allocation2] sm:$0x3] %vm748_vm12, %v2036_v2 }
0x11b6   :  { %2050 = dma.vmem_to_hbm [thread:$0]  %s2046_s29, 32, %s2048_s5, [#allocation3]  }
0x11ba   :  { %v2037_v33 = vpop.f32.mrf.mxu1 }
0x11bb   :  { %2669 = dma.done.wait [#allocation3], 32  }
0x11bc   :  { %2670 = vsyncadd [#allocation3], 4294967264 }
0x11bd   :  { %2055 = vsyncpa [#allocation3], 1 }

</bundles_post_ra>
